<compile_context>
chip_gen: v5e
topology: v5e:2x2
jax: 0.10.0
libtpu: 0.0.40
codegen_flags: <defaults>
</compile_context>

<pallas_src>
import functools

import numpy as np
import jax
import jax.numpy as jnp
from jax import lax
from jax.experimental import pallas as pl
from jax.experimental.pallas import tpu as pltpu

WINDOW_SIZE = 11
SIGMA = 1.5
PAD = WINDOW_SIZE // 2
EPS = 1e-6          # Charbonnier eps (module default)
LAMBDA = 1.0        # lambda_ (module default)
C1 = 0.01 ** 2
C2 = 0.03 ** 2


def _gaussian_1d(window_size=WINDOW_SIZE, sigma=SIGMA):
    xs = np.arange(window_size, dtype=np.float64)
    g = np.exp(-((xs - window_size // 2) ** 2) / (2.0 * sigma ** 2))
    g = g / g.sum()
    return g.astype(np.float32)


def _clipped_band(dim, g):
    """(dim, dim) matrix A with A[i, j] = g[j - i + PAD]: zero-padded 'same' 1D conv."""
    k = g.shape[0]
    a = np.zeros((dim, dim + k - 1), dtype=np.float32)
    for i in range(dim):
        a[i, i:i + k] = g
    return a[:, PAD:PAD + dim]


def _partial_tile(m):
    """Fold an (h, w) f32 map into an (8, 128) partial-sum tile.

    Aligned case: tile-aligned vector adds with 4 interleaved accumulators (no
    serial dependency chain, no cross-lane reduce).  The final scalar reduction
    happens outside the kernel in JAX.
    """
    h, w = m.shape
    if h % 8 == 0 and w % 128 == 0:
        tiles = [m[i * 8:(i + 1) * 8, j * 128:(j + 1) * 128]
                 for i in range(h // 8) for j in range(w // 128)]
        nacc = min(4, len(tiles))
        accs = list(tiles[:nacc])
        for idx, t in enumerate(tiles[nacc:]):
            accs[idx % nacc] = accs[idx % nacc] + t
        out = accs[0]
        for a in accs[1:]:
            out = out + a
        return out
    # Unaligned blocks (e.g. W < 128): spread the scalar sum over the tile.
    return jnp.full((8, 128), jnp.sum(m) / (8.0 * 128.0), jnp.float32)


def _loss_kernel(x_ref, y_ref, ah_ref, aw_ref, corr_ref, char_out_ref, ssim_out_ref):
    BH, W = x_ref.shape
    H = ah_ref.shape[0]
    B = BH // H

    x = x_ref[...]                  # (B*H, W) f32: B planes stacked along sublanes
    y = y_ref[...]
    ah = ah_ref[...]                # (H, H) bf16: row ('same', zero-pad) blur
    aw = aw_ref[...]                # (W, W) bf16: col ('same', zero-pad) blur
    corr = corr_ref[...]            # (B*H, W) f32: bf16 weight-sum correction

    def blur(q):                    # q: (B*H, W) f32
        # Column blur: one exact matmul, bf16 operands, f32 accumulation.
        qc = jnp.dot(q.astype(jnp.bfloat16), aw,
                     preferred_element_type=jnp.float32)
        qc = qc.astype(jnp.bfloat16)
        # Row blur: per-plane exact matmuls (no block-diagonal structural zeros).
        rows = [jnp.dot(ah, qc[b * H:(b + 1) * H, :],
                        preferred_element_type=jnp.float32)
                for b in range(B)]
        out = rows[0] if B == 1 else jnp.concatenate(rows, axis=0)
        # Restore the exact (f32) per-pixel blur weight sums so the
        # blur(x^2) - mu^2 cancellation is unaffected by bf16 weight rounding.
        return out * corr

    mu1 = blur(x)
    mu2 = blur(y)
    bxx = blur(x * x)
    byy = blur(y * y)
    bxy = blur(x * y)

    mu1_sq = mu1 * mu1
    mu2_sq = mu2 * mu2
    mu12 = mu1 * mu2
    sigma1_sq = bxx - mu1_sq
    sigma2_sq = byy - mu2_sq
    sigma12 = bxy - mu12

    num = (2.0 * mu12 + C1) * (2.0 * sigma12 + C2)
    den = (mu1_sq + mu2_sq + C1) * (sigma1_sq + sigma2_sq + C2)
    ssim_map = num * pl.reciprocal(den, approx=True)

    diff = x - y
    char = jnp.sqrt(diff * diff + EPS)

    char_out_ref[...] = _partial_tile(char)
    ssim_out_ref[...] = _partial_tile(ssim_map)


@functools.lru_cache(maxsize=None)
def _blur_constants(H, W, B):
    """Cached device constants: bf16 band matrices + f32 weight-sum correction."""
    g = _gaussian_1d()
    ahc = _clipped_band(H, g)             # (H, H) f32, row blur = ahc @ X
    awtc = _clipped_band(W, g).T          # (W, W) f32, col blur = X @ awtc
    ah_bf = jnp.asarray(ahc, dtype=jnp.bfloat16)
    aw_bf = jnp.asarray(awtc, dtype=jnp.bfloat16)
    # Per-pixel correction so the bf16 blur's effective weight sums match the
    # f32 ones exactly (separable: row-sum ratio x col-sum ratio).
    rh_bf = np.asarray(jnp.sum(ah_bf.astype(jnp.float32), axis=1))
    cw_bf = np.asarray(jnp.sum(aw_bf.astype(jnp.float32), axis=0))
    corr = (ahc.sum(axis=1) / rh_bf)[:, None] * (awtc.sum(axis=0) / cw_bf)[None, :]
    corr_t = jnp.asarray(np.tile(corr.astype(np.float32), (B, 1)))   # (B*H, W)
    return ah_bf, aw_bf, corr_t


def _pick_planes_per_block(NC, H, W):
    """Planes per grid step: keep (B*H, W) legal for the (8,128) BlockSpec rule,
    prefer >= 2 grid steps (both v7x TensorCores), target ~1 MiB f32 per block."""
    target = max(1, (256 * 1024) // (H * W))
    best = None
    for b in range(1, NC + 1):
        if NC % b:
            continue
        if (b * H) % 8 != 0 and b != NC:
            continue                       # sublane-dim legality
        two_core = (NC // b) >= 2 or NC == 1
        score = (two_core, -abs(b - target))
        if best is None or score > best[1]:
            best = (b, score)
    return best[0]


def _vmem_limit_bytes():
    try:
        cap = getattr(pltpu.get_tpu_info(), "vmem_capacity_bytes", None)
        if cap:
            # ~96 MiB on v5e/v6e (128 MiB physical), ~48 MiB on v7x (64 MiB).
            return min(int(cap) * 3 // 4, 96 * 1024 * 1024)
    except Exception:
        pass
    return 48 * 1024 * 1024


def charbonnier_plus_ssim(x, y, *, lambda_=LAMBDA):
    """Forward of CharbonnierLossPlusMSSSIM. x, y: (N, C, H, W) in [0, 1].

    Returns (loss, (loss_c, loss_s)).
    """
    N, C, H, W = x.shape
    NC = N * C
    B = _pick_planes_per_block(NC, H, W)
    num_blocks = NC // B

    ah_bf, aw_bf, corr_t = _blur_constants(H, W, B)

    # Free reshape (row-major collapse): no extra HBM transpose pass.
    x2 = x.reshape(NC * H, W).astype(jnp.float32)
    y2 = y.reshape(NC * H, W).astype(jnp.float32)

    char_p, ssim_p = pl.pallas_call(
        _loss_kernel,
        out_shape=(
            jax.ShapeDtypeStruct((num_blocks, 8, 128), jnp.float32),
            jax.ShapeDtypeStruct((num_blocks, 8, 128), jnp.float32),
        ),
        grid_spec=pltpu.PrefetchScalarGridSpec(
            num_scalar_prefetch=0,
            grid=(num_blocks,),
            in_specs=[
                pl.BlockSpec((B * H, W), lambda b: (b, 0)),
                pl.BlockSpec((B * H, W), lambda b: (b, 0)),
                pl.BlockSpec((H, H), lambda b: (0, 0)),
                pl.BlockSpec((W, W), lambda b: (0, 0)),
                pl.BlockSpec((B * H, W), lambda b: (0, 0)),
            ],
            out_specs=[
                pl.BlockSpec((None, 8, 128), lambda b: (b, 0, 0)),
                pl.BlockSpec((None, 8, 128), lambda b: (b, 0, 0)),
            ],
        ),
        compiler_params=pltpu.CompilerParams(
            dimension_semantics=("parallel",),
            vmem_limit_bytes=_vmem_limit_bytes(),
        ),
    )(x2, y2, ah_bf, aw_bf, corr_t)

    n_total = float(NC * H * W)
    loss_c = jnp.sum(char_p) / n_total
    loss_s = 1.0 - jnp.sum(ssim_p) / n_total
    loss = loss_c + lambda_ * loss_s
    return loss, (loss_c, loss_s)


def _reference(x, y, lambda_=LAMBDA):
    """Pure-JAX f32 reference mirroring torch + zero-padded windowed SSIM semantics."""
    N, C, H, W = x.shape
    g = _gaussian_1d()
    w2d = np.outer(g, g)
    window = jnp.asarray(np.tile(w2d[None, None], (C, 1, 1, 1)))  # (C,1,11,11)

    def dconv(img):
        return lax.conv_general_dilated(
            img, window, window_strides=(1, 1),
            padding=[(PAD, PAD), (PAD, PAD)],
            dimension_numbers=("NCHW", "OIHW", "NCHW"),
            feature_group_count=C,
            precision=lax.Precision.HIGHEST)

    mu1 = dconv(x)
    mu2 = dconv(y)
    mu1_sq, mu2_sq, mu12 = mu1 * mu1, mu2 * mu2, mu1 * mu2
    s11 = dconv(x * x) - mu1_sq
    s22 = dconv(y * y) - mu2_sq
    s12 = dconv(x * y) - mu12
    ssim_map = ((2 * mu12 + C1) * (2 * s12 + C2)) / (
        (mu1_sq + mu2_sq + C1) * (s11 + s22 + C2))
    diff = x - y
    loss_c = jnp.mean(jnp.sqrt(diff * diff + EPS))
    loss_s = 1.0 - jnp.mean(ssim_map)
    return loss_c + lambda_ * loss_s, loss_c, loss_s


if __name__ == "__main__":
    key = jax.random.PRNGKey(0)
    kx, ky = jax.random.split(key)
    shape = (2, 4, 16, 16)  # N, C, H, W
    x = jax.random.uniform(kx, shape, dtype=jnp.float32)
    y = jax.random.uniform(ky, shape, dtype=jnp.float32)

    loss, (loss_c, loss_s) = charbonnier_plus_ssim(x, y)
    jax.block_until_ready(loss)

    ref_loss, ref_c, ref_s = _reference(x, y)
    assert np.allclose(np.asarray(loss), np.asarray(ref_loss), rtol=2e-3, atol=5e-4)
    assert np.allclose(np.asarray(loss_c), np.asarray(ref_c), rtol=2e-3, atol=1e-5)
    assert np.allclose(np.asarray(loss_s), np.asarray(ref_s), rtol=2e-3, atol=5e-4)
    print("KERNEL_OK")
</pallas_src>

<mosaic_0001>
module attributes {stable_mosaic.version = 11 : i64} {
  func.func @_loss_kernel(%arg0: i32, %arg1: memref<64x16xf32, #tpu.memory_space<vmem>>, %arg2: memref<64x16xf32, #tpu.memory_space<vmem>>, %arg3: memref<16x16xbf16, #tpu.memory_space<vmem>>, %arg4: memref<16x16xbf16, #tpu.memory_space<vmem>>, %arg5: memref<64x16xf32, #tpu.memory_space<vmem>>, %arg6: memref<1x8x128xf32, #tpu.memory_space<vmem>>, %arg7: memref<1x8x128xf32, #tpu.memory_space<vmem>>) attributes {dimension_semantics = [#tpu.dimension_semantics<parallel>], iteration_bounds = array<i64: 2>, scalar_prefetch = 0 : i64, scratch_operands = 0 : i64, tpu.core_type = #tpu.core_type<tc>, window_params = [{transform_indices = @transform_0, window_bounds = array<i64: 64, 16>}, {transform_indices = @transform_1, window_bounds = array<i64: 64, 16>}, {pipeline_mode = #tpu.pipeline_mode<synchronous>, transform_indices = @transform_2, window_bounds = array<i64: 16, 16>}, {pipeline_mode = #tpu.pipeline_mode<synchronous>, transform_indices = @transform_3, window_bounds = array<i64: 16, 16>}, {pipeline_mode = #tpu.pipeline_mode<synchronous>, transform_indices = @transform_4, window_bounds = array<i64: 64, 16>}, {transform_indices = @transform_5, window_bounds = array<i64: 1, 8, 128>}, {transform_indices = @transform_6, window_bounds = array<i64: 1, 8, 128>}]} {
    %c0 = arith.constant 0 : index
    %c0_0 = arith.constant 0 : index
    %0 = vector.load %arg1[%c0, %c0_0] : memref<64x16xf32, #tpu.memory_space<vmem>>, vector<64x16xf32>
    %c0_1 = arith.constant 0 : index
    %c0_2 = arith.constant 0 : index
    %1 = vector.load %arg2[%c0_1, %c0_2] : memref<64x16xf32, #tpu.memory_space<vmem>>, vector<64x16xf32>
    %c0_3 = arith.constant 0 : index
    %c0_4 = arith.constant 0 : index
    %2 = vector.load %arg3[%c0_3, %c0_4] : memref<16x16xbf16, #tpu.memory_space<vmem>>, vector<16x16xbf16>
    %c0_5 = arith.constant 0 : index
    %c0_6 = arith.constant 0 : index
    %3 = vector.load %arg4[%c0_5, %c0_6] : memref<16x16xbf16, #tpu.memory_space<vmem>>, vector<16x16xbf16>
    %c0_7 = arith.constant 0 : index
    %c0_8 = arith.constant 0 : index
    %4 = vector.load %arg5[%c0_7, %c0_8] : memref<64x16xf32, #tpu.memory_space<vmem>>, vector<64x16xf32>
    %5 = arith.truncf %0 : vector<64x16xf32> to vector<64x16xbf16>
    %cst = arith.constant dense<0.000000e+00> : vector<64x16xf32>
    %6 = tpu.matmul %5, %3, %cst {dimension_numbers = #tpu.dot_dimension_numbers<[1], [0], [0], [1], [0, 0, 1, 1], [], []>} : vector<64x16xbf16>, vector<16x16xbf16>, vector<64x16xf32> -> vector<64x16xf32>
    %7 = arith.truncf %6 : vector<64x16xf32> to vector<64x16xbf16>
    %8 = vector.extract_strided_slice %7 {offsets = [0, 0], sizes = [16, 16], strides = [1, 1]} : vector<64x16xbf16> to vector<16x16xbf16>
    %cst_9 = arith.constant dense<0.000000e+00> : vector<16x16xf32>
    %9 = tpu.matmul %2, %8, %cst_9 {dimension_numbers = #tpu.dot_dimension_numbers<[1], [0], [0], [1], [0, 0, 1, 1], [], []>} : vector<16x16xbf16>, vector<16x16xbf16>, vector<16x16xf32> -> vector<16x16xf32>
    %10 = vector.extract_strided_slice %7 {offsets = [16, 0], sizes = [16, 16], strides = [1, 1]} : vector<64x16xbf16> to vector<16x16xbf16>
    %cst_10 = arith.constant dense<0.000000e+00> : vector<16x16xf32>
    %11 = tpu.matmul %2, %10, %cst_10 {dimension_numbers = #tpu.dot_dimension_numbers<[1], [0], [0], [1], [0, 0, 1, 1], [], []>} : vector<16x16xbf16>, vector<16x16xbf16>, vector<16x16xf32> -> vector<16x16xf32>
    %12 = vector.extract_strided_slice %7 {offsets = [32, 0], sizes = [16, 16], strides = [1, 1]} : vector<64x16xbf16> to vector<16x16xbf16>
    %cst_11 = arith.constant dense<0.000000e+00> : vector<16x16xf32>
    %13 = tpu.matmul %2, %12, %cst_11 {dimension_numbers = #tpu.dot_dimension_numbers<[1], [0], [0], [1], [0, 0, 1, 1], [], []>} : vector<16x16xbf16>, vector<16x16xbf16>, vector<16x16xf32> -> vector<16x16xf32>
    %14 = vector.extract_strided_slice %7 {offsets = [48, 0], sizes = [16, 16], strides = [1, 1]} : vector<64x16xbf16> to vector<16x16xbf16>
    %cst_12 = arith.constant dense<0.000000e+00> : vector<16x16xf32>
    %15 = tpu.matmul %2, %14, %cst_12 {dimension_numbers = #tpu.dot_dimension_numbers<[1], [0], [0], [1], [0, 0, 1, 1], [], []>} : vector<16x16xbf16>, vector<16x16xbf16>, vector<16x16xf32> -> vector<16x16xf32>
    %16 = tpu.concatenate %9, %11, %13, %15 in 0 : vector<16x16xf32>, vector<16x16xf32>, vector<16x16xf32>, vector<16x16xf32> -> vector<64x16xf32>
    %17 = arith.mulf %16, %4 : vector<64x16xf32>
    %18 = arith.truncf %1 : vector<64x16xf32> to vector<64x16xbf16>
    %cst_13 = arith.constant dense<0.000000e+00> : vector<64x16xf32>
    %19 = tpu.matmul %18, %3, %cst_13 {dimension_numbers = #tpu.dot_dimension_numbers<[1], [0], [0], [1], [0, 0, 1, 1], [], []>} : vector<64x16xbf16>, vector<16x16xbf16>, vector<64x16xf32> -> vector<64x16xf32>
    %20 = arith.truncf %19 : vector<64x16xf32> to vector<64x16xbf16>
    %21 = vector.extract_strided_slice %20 {offsets = [0, 0], sizes = [16, 16], strides = [1, 1]} : vector<64x16xbf16> to vector<16x16xbf16>
    %cst_14 = arith.constant dense<0.000000e+00> : vector<16x16xf32>
    %22 = tpu.matmul %2, %21, %cst_14 {dimension_numbers = #tpu.dot_dimension_numbers<[1], [0], [0], [1], [0, 0, 1, 1], [], []>} : vector<16x16xbf16>, vector<16x16xbf16>, vector<16x16xf32> -> vector<16x16xf32>
    %23 = vector.extract_strided_slice %20 {offsets = [16, 0], sizes = [16, 16], strides = [1, 1]} : vector<64x16xbf16> to vector<16x16xbf16>
    %cst_15 = arith.constant dense<0.000000e+00> : vector<16x16xf32>
    %24 = tpu.matmul %2, %23, %cst_15 {dimension_numbers = #tpu.dot_dimension_numbers<[1], [0], [0], [1], [0, 0, 1, 1], [], []>} : vector<16x16xbf16>, vector<16x16xbf16>, vector<16x16xf32> -> vector<16x16xf32>
    %25 = vector.extract_strided_slice %20 {offsets = [32, 0], sizes = [16, 16], strides = [1, 1]} : vector<64x16xbf16> to vector<16x16xbf16>
    %cst_16 = arith.constant dense<0.000000e+00> : vector<16x16xf32>
    %26 = tpu.matmul %2, %25, %cst_16 {dimension_numbers = #tpu.dot_dimension_numbers<[1], [0], [0], [1], [0, 0, 1, 1], [], []>} : vector<16x16xbf16>, vector<16x16xbf16>, vector<16x16xf32> -> vector<16x16xf32>
    %27 = vector.extract_strided_slice %20 {offsets = [48, 0], sizes = [16, 16], strides = [1, 1]} : vector<64x16xbf16> to vector<16x16xbf16>
    %cst_17 = arith.constant dense<0.000000e+00> : vector<16x16xf32>
    %28 = tpu.matmul %2, %27, %cst_17 {dimension_numbers = #tpu.dot_dimension_numbers<[1], [0], [0], [1], [0, 0, 1, 1], [], []>} : vector<16x16xbf16>, vector<16x16xbf16>, vector<16x16xf32> -> vector<16x16xf32>
    %29 = tpu.concatenate %22, %24, %26, %28 in 0 : vector<16x16xf32>, vector<16x16xf32>, vector<16x16xf32>, vector<16x16xf32> -> vector<64x16xf32>
    %30 = arith.mulf %29, %4 : vector<64x16xf32>
    %31 = arith.mulf %0, %0 : vector<64x16xf32>
    %32 = arith.truncf %31 : vector<64x16xf32> to vector<64x16xbf16>
    %cst_18 = arith.constant dense<0.000000e+00> : vector<64x16xf32>
    %33 = tpu.matmul %32, %3, %cst_18 {dimension_numbers = #tpu.dot_dimension_numbers<[1], [0], [0], [1], [0, 0, 1, 1], [], []>} : vector<64x16xbf16>, vector<16x16xbf16>, vector<64x16xf32> -> vector<64x16xf32>
    %34 = arith.truncf %33 : vector<64x16xf32> to vector<64x16xbf16>
    %35 = vector.extract_strided_slice %34 {offsets = [0, 0], sizes = [16, 16], strides = [1, 1]} : vector<64x16xbf16> to vector<16x16xbf16>
    %cst_19 = arith.constant dense<0.000000e+00> : vector<16x16xf32>
    %36 = tpu.matmul %2, %35, %cst_19 {dimension_numbers = #tpu.dot_dimension_numbers<[1], [0], [0], [1], [0, 0, 1, 1], [], []>} : vector<16x16xbf16>, vector<16x16xbf16>, vector<16x16xf32> -> vector<16x16xf32>
    %37 = vector.extract_strided_slice %34 {offsets = [16, 0], sizes = [16, 16], strides = [1, 1]} : vector<64x16xbf16> to vector<16x16xbf16>
    %cst_20 = arith.constant dense<0.000000e+00> : vector<16x16xf32>
    %38 = tpu.matmul %2, %37, %cst_20 {dimension_numbers = #tpu.dot_dimension_numbers<[1], [0], [0], [1], [0, 0, 1, 1], [], []>} : vector<16x16xbf16>, vector<16x16xbf16>, vector<16x16xf32> -> vector<16x16xf32>
    %39 = vector.extract_strided_slice %34 {offsets = [32, 0], sizes = [16, 16], strides = [1, 1]} : vector<64x16xbf16> to vector<16x16xbf16>
    %cst_21 = arith.constant dense<0.000000e+00> : vector<16x16xf32>
    %40 = tpu.matmul %2, %39, %cst_21 {dimension_numbers = #tpu.dot_dimension_numbers<[1], [0], [0], [1], [0, 0, 1, 1], [], []>} : vector<16x16xbf16>, vector<16x16xbf16>, vector<16x16xf32> -> vector<16x16xf32>
    %41 = vector.extract_strided_slice %34 {offsets = [48, 0], sizes = [16, 16], strides = [1, 1]} : vector<64x16xbf16> to vector<16x16xbf16>
    %cst_22 = arith.constant dense<0.000000e+00> : vector<16x16xf32>
    %42 = tpu.matmul %2, %41, %cst_22 {dimension_numbers = #tpu.dot_dimension_numbers<[1], [0], [0], [1], [0, 0, 1, 1], [], []>} : vector<16x16xbf16>, vector<16x16xbf16>, vector<16x16xf32> -> vector<16x16xf32>
    %43 = tpu.concatenate %36, %38, %40, %42 in 0 : vector<16x16xf32>, vector<16x16xf32>, vector<16x16xf32>, vector<16x16xf32> -> vector<64x16xf32>
    %44 = arith.mulf %43, %4 : vector<64x16xf32>
    %45 = arith.mulf %1, %1 : vector<64x16xf32>
    %46 = arith.truncf %45 : vector<64x16xf32> to vector<64x16xbf16>
    %cst_23 = arith.constant dense<0.000000e+00> : vector<64x16xf32>
    %47 = tpu.matmul %46, %3, %cst_23 {dimension_numbers = #tpu.dot_dimension_numbers<[1], [0], [0], [1], [0, 0, 1, 1], [], []>} : vector<64x16xbf16>, vector<16x16xbf16>, vector<64x16xf32> -> vector<64x16xf32>
    %48 = arith.truncf %47 : vector<64x16xf32> to vector<64x16xbf16>
    %49 = vector.extract_strided_slice %48 {offsets = [0, 0], sizes = [16, 16], strides = [1, 1]} : vector<64x16xbf16> to vector<16x16xbf16>
    %cst_24 = arith.constant dense<0.000000e+00> : vector<16x16xf32>
    %50 = tpu.matmul %2, %49, %cst_24 {dimension_numbers = #tpu.dot_dimension_numbers<[1], [0], [0], [1], [0, 0, 1, 1], [], []>} : vector<16x16xbf16>, vector<16x16xbf16>, vector<16x16xf32> -> vector<16x16xf32>
    %51 = vector.extract_strided_slice %48 {offsets = [16, 0], sizes = [16, 16], strides = [1, 1]} : vector<64x16xbf16> to vector<16x16xbf16>
    %cst_25 = arith.constant dense<0.000000e+00> : vector<16x16xf32>
    %52 = tpu.matmul %2, %51, %cst_25 {dimension_numbers = #tpu.dot_dimension_numbers<[1], [0], [0], [1], [0, 0, 1, 1], [], []>} : vector<16x16xbf16>, vector<16x16xbf16>, vector<16x16xf32> -> vector<16x16xf32>
    %53 = vector.extract_strided_slice %48 {offsets = [32, 0], sizes = [16, 16], strides = [1, 1]} : vector<64x16xbf16> to vector<16x16xbf16>
    %cst_26 = arith.constant dense<0.000000e+00> : vector<16x16xf32>
    %54 = tpu.matmul %2, %53, %cst_26 {dimension_numbers = #tpu.dot_dimension_numbers<[1], [0], [0], [1], [0, 0, 1, 1], [], []>} : vector<16x16xbf16>, vector<16x16xbf16>, vector<16x16xf32> -> vector<16x16xf32>
    %55 = vector.extract_strided_slice %48 {offsets = [48, 0], sizes = [16, 16], strides = [1, 1]} : vector<64x16xbf16> to vector<16x16xbf16>
    %cst_27 = arith.constant dense<0.000000e+00> : vector<16x16xf32>
    %56 = tpu.matmul %2, %55, %cst_27 {dimension_numbers = #tpu.dot_dimension_numbers<[1], [0], [0], [1], [0, 0, 1, 1], [], []>} : vector<16x16xbf16>, vector<16x16xbf16>, vector<16x16xf32> -> vector<16x16xf32>
    %57 = tpu.concatenate %50, %52, %54, %56 in 0 : vector<16x16xf32>, vector<16x16xf32>, vector<16x16xf32>, vector<16x16xf32> -> vector<64x16xf32>
    %58 = arith.mulf %57, %4 : vector<64x16xf32>
    %59 = arith.mulf %0, %1 : vector<64x16xf32>
    %60 = arith.truncf %59 : vector<64x16xf32> to vector<64x16xbf16>
    %cst_28 = arith.constant dense<0.000000e+00> : vector<64x16xf32>
    %61 = tpu.matmul %60, %3, %cst_28 {dimension_numbers = #tpu.dot_dimension_numbers<[1], [0], [0], [1], [0, 0, 1, 1], [], []>} : vector<64x16xbf16>, vector<16x16xbf16>, vector<64x16xf32> -> vector<64x16xf32>
    %62 = arith.truncf %61 : vector<64x16xf32> to vector<64x16xbf16>
    %63 = vector.extract_strided_slice %62 {offsets = [0, 0], sizes = [16, 16], strides = [1, 1]} : vector<64x16xbf16> to vector<16x16xbf16>
    %cst_29 = arith.constant dense<0.000000e+00> : vector<16x16xf32>
    %64 = tpu.matmul %2, %63, %cst_29 {dimension_numbers = #tpu.dot_dimension_numbers<[1], [0], [0], [1], [0, 0, 1, 1], [], []>} : vector<16x16xbf16>, vector<16x16xbf16>, vector<16x16xf32> -> vector<16x16xf32>
    %65 = vector.extract_strided_slice %62 {offsets = [16, 0], sizes = [16, 16], strides = [1, 1]} : vector<64x16xbf16> to vector<16x16xbf16>
    %cst_30 = arith.constant dense<0.000000e+00> : vector<16x16xf32>
    %66 = tpu.matmul %2, %65, %cst_30 {dimension_numbers = #tpu.dot_dimension_numbers<[1], [0], [0], [1], [0, 0, 1, 1], [], []>} : vector<16x16xbf16>, vector<16x16xbf16>, vector<16x16xf32> -> vector<16x16xf32>
    %67 = vector.extract_strided_slice %62 {offsets = [32, 0], sizes = [16, 16], strides = [1, 1]} : vector<64x16xbf16> to vector<16x16xbf16>
    %cst_31 = arith.constant dense<0.000000e+00> : vector<16x16xf32>
    %68 = tpu.matmul %2, %67, %cst_31 {dimension_numbers = #tpu.dot_dimension_numbers<[1], [0], [0], [1], [0, 0, 1, 1], [], []>} : vector<16x16xbf16>, vector<16x16xbf16>, vector<16x16xf32> -> vector<16x16xf32>
    %69 = vector.extract_strided_slice %62 {offsets = [48, 0], sizes = [16, 16], strides = [1, 1]} : vector<64x16xbf16> to vector<16x16xbf16>
    %cst_32 = arith.constant dense<0.000000e+00> : vector<16x16xf32>
    %70 = tpu.matmul %2, %69, %cst_32 {dimension_numbers = #tpu.dot_dimension_numbers<[1], [0], [0], [1], [0, 0, 1, 1], [], []>} : vector<16x16xbf16>, vector<16x16xbf16>, vector<16x16xf32> -> vector<16x16xf32>
    %71 = tpu.concatenate %64, %66, %68, %70 in 0 : vector<16x16xf32>, vector<16x16xf32>, vector<16x16xf32>, vector<16x16xf32> -> vector<64x16xf32>
    %72 = arith.mulf %71, %4 : vector<64x16xf32>
    %73 = arith.mulf %17, %17 : vector<64x16xf32>
    %74 = arith.mulf %30, %30 : vector<64x16xf32>
    %75 = arith.mulf %17, %30 : vector<64x16xf32>
    %76 = arith.subf %44, %73 : vector<64x16xf32>
    %77 = arith.subf %58, %74 : vector<64x16xf32>
    %78 = arith.subf %72, %75 : vector<64x16xf32>
    %cst_33 = arith.constant 2.000000e+00 : f32
    %79 = vector.broadcast %cst_33 : f32 to vector<64x16xf32>
    %80 = arith.mulf %79, %75 : vector<64x16xf32>
    %cst_34 = arith.constant 9.99999974E-5 : f32
    %81 = vector.broadcast %cst_34 : f32 to vector<64x16xf32>
    %82 = arith.addf %80, %81 : vector<64x16xf32>
    %cst_35 = arith.constant 2.000000e+00 : f32
    %83 = vector.broadcast %cst_35 : f32 to vector<64x16xf32>
    %84 = arith.mulf %83, %78 : vector<64x16xf32>
    %cst_36 = arith.constant 8.99999984E-4 : f32
    %85 = vector.broadcast %cst_36 : f32 to vector<64x16xf32>
    %86 = arith.addf %84, %85 : vector<64x16xf32>
    %87 = arith.mulf %82, %86 : vector<64x16xf32>
    %88 = arith.addf %73, %74 : vector<64x16xf32>
    %cst_37 = arith.constant 9.99999974E-5 : f32
    %89 = vector.broadcast %cst_37 : f32 to vector<64x16xf32>
    %90 = arith.addf %88, %89 : vector<64x16xf32>
    %91 = arith.addf %76, %77 : vector<64x16xf32>
    %cst_38 = arith.constant 8.99999984E-4 : f32
    %92 = vector.broadcast %cst_38 : f32 to vector<64x16xf32>
    %93 = arith.addf %91, %92 : vector<64x16xf32>
    %94 = arith.mulf %90, %93 : vector<64x16xf32>
    %95 = tpu.reciprocal %94 {approx = true} : vector<64x16xf32> -> vector<64x16xf32>
    %96 = arith.mulf %87, %95 : vector<64x16xf32>
    %97 = arith.subf %0, %1 : vector<64x16xf32>
    %98 = arith.mulf %97, %97 : vector<64x16xf32>
    %cst_39 = arith.constant 9.99999997E-7 : f32
    %99 = vector.broadcast %cst_39 : f32 to vector<64x16xf32>
    %100 = arith.addf %98, %99 : vector<64x16xf32>
    %101 = math.sqrt %100 : vector<64x16xf32>
    %102 = vector.shape_cast %101 : vector<64x16xf32> to vector<1x64x16xf32>
    %cst_40 = arith.constant dense<0.000000e+00> : vector<1xf32>
    %103 = vector.multi_reduction <add>, %102, %cst_40 [1, 2] : vector<1x64x16xf32> to vector<1xf32>
    %104 = vector.shape_cast %103 : vector<1xf32> to vector<1x1x1xf32>
    %105 = vector.extract %104[0, 0, 0] : f32 from vector<1x1x1xf32>
    %cst_41 = arith.constant 1.024000e+03 : f32
    %106 = arith.divf %105, %cst_41 : f32
    %107 = vector.broadcast %106 : f32 to vector<8x128xf32>
    %c0_42 = arith.constant 0 : index
    %c0_43 = arith.constant 0 : index
    %c0_44 = arith.constant 0 : index
    %108 = vector.load %arg6[%c0_42, %c0_43, %c0_44] : memref<1x8x128xf32, #tpu.memory_space<vmem>>, vector<1x8x128xf32>
    %109 = vector.shape_cast %108 : vector<1x8x128xf32> to vector<8x128xf32>
    %110 = vector.shape_cast %107 : vector<8x128xf32> to vector<1x8x128xf32>
    tpu.vector_store %arg6[%c0_42, %c0_43, %c0_44], %110 {strides = array<i32>} : memref<1x8x128xf32, #tpu.memory_space<vmem>>, vector<1x8x128xf32>,
    %111 = vector.shape_cast %96 : vector<64x16xf32> to vector<1x64x16xf32>
    %cst_45 = arith.constant dense<0.000000e+00> : vector<1xf32>
    %112 = vector.multi_reduction <add>, %111, %cst_45 [1, 2] : vector<1x64x16xf32> to vector<1xf32>
    %113 = vector.shape_cast %112 : vector<1xf32> to vector<1x1x1xf32>
    %114 = vector.extract %113[0, 0, 0] : f32 from vector<1x1x1xf32>
    %cst_46 = arith.constant 1.024000e+03 : f32
    %115 = arith.divf %114, %cst_46 : f32
    %116 = vector.broadcast %115 : f32 to vector<8x128xf32>
    %c0_47 = arith.constant 0 : index
    %c0_48 = arith.constant 0 : index
    %c0_49 = arith.constant 0 : index
    %117 = vector.load %arg7[%c0_47, %c0_48, %c0_49] : memref<1x8x128xf32, #tpu.memory_space<vmem>>, vector<1x8x128xf32>
    %118 = vector.shape_cast %117 : vector<1x8x128xf32> to vector<8x128xf32>
    %119 = vector.shape_cast %116 : vector<8x128xf32> to vector<1x8x128xf32>
    tpu.vector_store %arg7[%c0_47, %c0_48, %c0_49], %119 {strides = array<i32>} : memref<1x8x128xf32, #tpu.memory_space<vmem>>, vector<1x8x128xf32>,
    return
  }
  func.func @transform_0(%arg0: i32) -> (i32, i32) {
    %c0_i32 = arith.constant 0 : i32
    %c0_i32_0 = arith.constant 0 : i32
    return %arg0, %c0_i32 : i32, i32
  }
  func.func @transform_1(%arg0: i32) -> (i32, i32) {
    %c0_i32 = arith.constant 0 : i32
    %c0_i32_0 = arith.constant 0 : i32
    return %arg0, %c0_i32 : i32, i32
  }
  func.func @transform_2(%arg0: i32) -> (i32, i32) {
    %c0_i32 = arith.constant 0 : i32
    %c0_i32_0 = arith.constant 0 : i32
    %c0_i32_1 = arith.constant 0 : i32
    return %c0_i32, %c0_i32_0 : i32, i32
  }
  func.func @transform_3(%arg0: i32) -> (i32, i32) {
    %c0_i32 = arith.constant 0 : i32
    %c0_i32_0 = arith.constant 0 : i32
    %c0_i32_1 = arith.constant 0 : i32
    return %c0_i32, %c0_i32_0 : i32, i32
  }
  func.func @transform_4(%arg0: i32) -> (i32, i32) {
    %c0_i32 = arith.constant 0 : i32
    %c0_i32_0 = arith.constant 0 : i32
    %c0_i32_1 = arith.constant 0 : i32
    return %c0_i32, %c0_i32_0 : i32, i32
  }
  func.func @transform_5(%arg0: i32) -> (i32, i32, i32) {
    %c0_i32 = arith.constant 0 : i32
    %c0_i32_0 = arith.constant 0 : i32
    %c0_i32_1 = arith.constant 0 : i32
    return %arg0, %c0_i32, %c0_i32_0 : i32, i32, i32
  }
  func.func @transform_6(%arg0: i32) -> (i32, i32, i32) {
    %c0_i32 = arith.constant 0 : i32
    %c0_i32_0 = arith.constant 0 : i32
    %c0_i32_1 = arith.constant 0 : i32
    return %arg0, %c0_i32, %c0_i32_0 : i32, i32, i32
  }
}

</mosaic_0001>

<bundles_post_ra>
// kernel: tpu_custom_call.1
= control target key start
LH: loop header
LB: loop body
LE: loop exit
PB: predicated region body
PF: predicated region fallthrough
CT: control target
= control target key end

     0   :  { %s2569_s0 = inlined_call_operand.vmem [shape: f32[128,16], index: 0, kind: input, shape index: {}]   ;;  %s2570_s1 = inlined_call_operand.vmem [shape: f32[128,16], index: 1, kind: input, shape index: {}]   ;;  %s2571_s2 = inlined_call_operand.vmem [shape: bf16[16,16], index: 2, kind: input, shape index: {}]   ;;  %s2572_s3 = inlined_call_operand.vmem [shape: bf16[16,16], index: 3, kind: input, shape index: {}]   ;;  %s2573_s4 = inlined_call_operand.vmem [shape: f32[64,16], index: 4, kind: input, shape index: {}]   ;;  %s2574_s5 = inlined_call_operand.hbm [shape: f32[2,8,128], index: 5, kind: output, shape index: {0}]   ;;  %s2575_s6 = inlined_call_operand.hbm [shape: f32[2,8,128], index: 6, kind: output, shape index: {1}]  }
   0x1   :  { %2588 = sst [smem:[#allocation22_spill]] %s2569_s0 }
   0x2   :  { %2589 = sst [smem:[#allocation23_spill]] %s2570_s1 }
   0x3   :  { %2590 = sst [smem:[#allocation24_spill]] %s2571_s2 }
   0x4   :  { %12 = vsyncpa [#allocation3], 0 }
   0x5   :  { %14 = vsyncpa [#allocation3 + $0x1], 0 }
   0x6   :  { %15 = vsyncpa [#allocation5], 0 }
   0x7   :  { %17 = vsyncpa [#allocation5 + $0x1], 0  ;;  %s1814_s21 = smov 0   ;;  %s1816_s22 = smov 0  }
   0x8   :  { %s1818_s23 = smov 0   ;;  %s1820_s24 = smov 0  }
   0x9 LB: > { %s1530_s25 = sadd.s32 4294967295, %s1776_s24   ;;  %s1531_s26 = sadd.s32 4294967294, %s1776_s24   ;;  %s1776_s24 = sphi %s1820_s24, %s2631_s24   ;;  %s1772_s23 = sphi %s1818_s23, %s2630_s23   ;;  %s1768_s22 = sphi %s1816_s22, %s2629_s22   ;;  %s1764_s21 = sphi %s1814_s21, %s2628_s21  }
   0xa   : > { %s1837_s27 = sadd.s32 1, %s1776_s24   ;;  %s145_s28 = sadd.s32 1, %s1772_s23 }
   0xb   : > { %s142_s29 = ssub.s32 %s1776_s24, %s1837_s27  ;;  %p155_p0 = scmp.ne.s32.totalorder %s1772_s23, %s1768_s22 }
   0xc   : > { %p143_p1 = scmp.eq.s32.totalorder %s142_s29, 0  ;;  %p156_p2 = scmp.eq.s32.totalorder %s1530_s25, 1 }
   0xd   : > { %p161_p3 = scmp.ne.s32.totalorder %s1768_s22, %s1764_s21  ;;  %p162_p4 = scmp.eq.s32.totalorder %s1531_s26, 1 }
   0xe   : > { %s1847_s30 = scalar_select %p143_p1, %s1772_s23, %s145_s28  }
   0xf   : > { %p1849_p5 = por %p156_p2, %p155_p0  ;;  %p1853_p6 = por %p162_p4, %p161_p3 }
  0x10   : > { %p1534_p7 = scmp.ge.s32.totalorder %s1776_s24, 1  ;;  %p233_p8 = scmp.lt.s32.totalorder %s1776_s24, 3 }
  0x12   : > { %p234_p9 = pnand %p1534_p7, %p233_p8 }
  0x14   : > { %237 = sbr.rel (%p234_p9) target bundleno = 1017 (0x3f9), region = 40 }
  0x19   : > { %v1862_v0 = vld [vmem:[%s2572_s3] sm:$0xff]  ;;  %s1864_s11 = sshll.u32 %s1530_s25, 3  ;;  %s2593_s0 = sld [smem:[#allocation22_spill]]  ;;  %vm324_vm0 = vcmask 130048  }
  0x1a   : > { %p274_p10 = scmp.lt.s32.totalorder %s1864_s11, 15  ;;  %344 = vmatpush.bf16.msra.mxu0 %v1862_v0  ;;  %s2594_s2 = sld [smem:[#allocation24_spill]] }
  0x1b   : > { %s2595_s1 = sld [smem:[#allocation23_spill]]  ;;  %s2519_s28 = sand.u32 1, %s1768_s22  }
  0x1c   : > { %s1869_s12 = scalar_select %p274_p10, %s1864_s11, 15 }
  0x1d   : > { %s1535_s29 = sshll.u32 %s2519_s28, 3  ;;  %s1393_s19 = scalar_lea.sflag [#allocation3], %s2519_s28 }
  0x1e   : > { %s1538_s13 = sshll.u32 %s1869_s12, 3  ;;  %s1408_s12 = scalar_lea.hbm %s2574_s5, %s1864_s11 }
  0x1f   : > { %s1877_s16 = scalar_lea.vmem %s2593_s0, %s1538_s13  ;;  %s1702_s10 = scalar_lea.hbm %s2574_s5, 16 }
  0x20   : > { %v1880_v1 = vld [vmem:[%s1877_s16] sm:$0xff]  ;;  %v1883_v2 = vld [vmem:[%s1877_s16 + $0x8] sm:$0xff]  ;;  %v1889_v4 = vld [vmem:[%s1877_s16 + $0x10] sm:$0xff] }
  0x21   : > { %v314_v3 = vpack.c.bf16 %v1883_v2, %v1880_v1  ;;  %v1892_v5 = vld [vmem:[%s1877_s16 + $0x18] sm:$0xff]  ;;  %v1898_v7 = vld [vmem:[%s1877_s16 + $0x20] sm:$0xff]  ;;  %v1901_v8 = vld [vmem:[%s1877_s16 + $0x28] sm:$0xff]  ;;  %s283_s25 = scalar_lea.vmem %s2595_s1, %s1538_s13  ;;  %s265_s13 = scalar_lea.vmem [#allocation2], %s1535_s29 }
  0x22   : > { %v315_v6 = vpack.c.bf16 %v1892_v5, %v1889_v4  ;;  %v316_v9 = vpack.c.bf16 %v1901_v8, %v1898_v7  ;;  %v1909_v18 = vld [vmem:[%s2594_s2] sm:$0xff]  ;;  %v1916_v26 = vld [vmem:[%s1877_s16 + $0x30] sm:$0xff]  ;;  %v1919_v27 = vld [vmem:[%s1877_s16 + $0x38] sm:$0xff]  ;;  %s1410_s14 = sshll.u32 %s265_s13, 4  ;;  %s1412_s16 = sshll.u32 %s1408_s12, 4  ;;  %s1411_s14 = int_to_ptr.vmem [resolvable:$true] %s1410_s14  ;;  %s1413_s16 = int_to_ptr.hbm [resolvable:$true] %s1412_s16 }
  0x23   : > { %1545 = vmatmul.msk.bf16.vlgmr.msra.gmra.mxu0 %vm324_vm0, %v314_v3  ;;  %v317_v28 = vpack.c.bf16 %v1919_v27, %v1916_v26  ;;  %v1933_v35 = vld [vmem:[%s283_s25] sm:$0xff]  ;;  %v1935_v36 = vld [vmem:[%s283_s25 + $0x8] sm:$0xff]  ;;  %v1940_v38 = vld [vmem:[%s283_s25 + $0x10] sm:$0xff]  ;;  %s1696_s20 = sshra.s32 %s1413_s16, 4  ;;  %s1697_s20 = int_to_ptr.hbm [resolvable:$true] %s1696_s20 }
  0x24   : > { %v470_v37 = vpack.c.bf16 %v1935_v36, %v1933_v35  ;;  %v1942_v39 = vld [vmem:[%s283_s25 + $0x18] sm:$0xff]  ;;  %v1947_v41 = vld [vmem:[%s283_s25 + $0x20] sm:$0xff]  ;;  %v1949_v42 = vld [vmem:[%s283_s25 + $0x28] sm:$0xff]  ;;  %p1703_p0 = scmp.lt.s32.totalorder %s1697_s20, %s2574_s5 }
  0x25   : > { %v471_v40 = vpack.c.bf16 %v1942_v39, %v1940_v38  ;;  %v472_v43 = vpack.c.bf16 %v1949_v42, %v1947_v41  ;;  %v1964_v57 = vld [vmem:[%s283_s25 + $0x30] sm:$0xff]  ;;  %v1966_v58 = vld [vmem:[%s283_s25 + $0x38] sm:$0xff]  ;;  %s1698_s25 = scalar_lea.hbm %s1697_s20, 8 }
  0x26   : > { %v473_v60 = vpack.c.bf16 %v1966_v58, %v1964_v57  ;;  %p1699_p11 = scmp.ne.s32.totalorder %s1697_s20, %s1698_s25  ;;  %p1704_p1 = scmp.lt.s32.totalorder %s1702_s10, %s1698_s25 }
  0x28   : > { %p1700_p12 = pnand %p1699_p11, %p1849_p5  ;;  %p1705_p2 = por %p1704_p1, %p1703_p0 }
  0x2a   : > { %p1701_p13 = pneg %p1700_p12 }
  0x2c   : > { %p1706_p3 = pnand %p1705_p2, %p1701_p13 }
  0x33   : > { %1546 = vmatmul.msk.bf16.gmra.mxu0 %vm324_vm0, %v315_v6  ;;  %v611_v6 = vmul.f32 %v1880_v1, %v1880_v1 }
  0x43   : > { %1547 = vmatmul.msk.bf16.gmra.mxu0 %vm324_vm0, %v316_v9  ;;  %v612_v9 = vmul.f32 %v1883_v2, %v1883_v2 }
  0x53   : > { %1548 = vmatmul.msk.bf16.gmra.mxu0 %vm324_vm0, %v317_v28  ;;  %v760_v28 = vmul.f32 %v1933_v35, %v1933_v35 }
  0xa0   : > { %v346_v10 = vpop.f32.mrf.mxu0 }
  0xa1   : > { %v366_v11 = vpack.c.bf16 %v346_v10, %v346_v10 }
  0xa3   : > { %v381_v14 = vunpack.c.l.b16 %v366_v11  ;;  %v619_v11 = vpack.c.bf16 %v612_v9, %v611_v6  ;;  %v911_v9 = vmul.f32 %v1940_v38, %v1889_v4 }
  0xa8   : > { %v348_v12 = vpop.f32.mrf.mxu0 }
  0xa9   : > { %v367_v13 = vpack.c.bf16 %v348_v12, %v348_v12 }
  0xab   : > { %v382_v15 = vunpack.c.l.b16 %v367_v13 }
  0xad   : > { %v383_v16 = vpack.c.b16 %v382_v15, %v381_v14 }
  0xaf   : > { %395 = vmatpush.bf16.msra.mxu1 %v383_v16 }
  0xb0   : > { %v351_v17 = vpop.f32.mrf.mxu0 }
  0xb1   : > { %v368_v19 = vpack.c.bf16 %v351_v17, %v351_v17 }
  0xb2   : > { %1553 = vmatmul.msk.bf16.vlgmr.msra.gmra.mxu1 %vm324_vm0, %v1909_v18 }
  0xb3   : > { %v404_v22 = vunpack.c.l.b16 %v368_v19 }
  0xb8   : > { %v353_v20 = vpop.f32.mrf.mxu0 }
  0xb9   : > { %v369_v21 = vpack.c.bf16 %v353_v20, %v353_v20 }
  0xbb   : > { %v405_v23 = vunpack.c.l.b16 %v369_v21 }
  0xbd   : > { %v406_v24 = vpack.c.b16 %v405_v23, %v404_v22 }
  0xbf   : > { %415 = vmatpush.bf16.msra.mxu2 %v406_v24 }
  0xc0   : > { %v356_v25 = vpop.f32.mrf.mxu0 }
  0xc1   : > { %v370_v29 = vpack.c.bf16 %v356_v25, %v356_v25 }
  0xc2   : > { %1554 = vmatmul.msk.bf16.vlgmr.msra.gmra.mxu2 %vm324_vm0, %v1909_v18 }
  0xc3   : > { %v424_v32 = vunpack.c.l.b16 %v370_v29  ;;  %v761_v29 = vmul.f32 %v1935_v36, %v1935_v36 }
  0xc8   : > { %v358_v30 = vpop.f32.mrf.mxu0 }
  0xc9   : > { %v371_v31 = vpack.c.bf16 %v358_v30, %v358_v30  ;;  %v768_v30 = vpack.c.bf16 %v761_v29, %v760_v28 }
  0xcb   : > { %v425_v33 = vunpack.c.l.b16 %v371_v31  ;;  %v762_v31 = vmul.f32 %v1940_v38, %v1940_v38 }
  0xcd   : > { %v426_v34 = vpack.c.b16 %v425_v33, %v424_v32  ;;  %v763_v32 = vmul.f32 %v1942_v39, %v1942_v39 }
  0xcf   : > { %435 = vmatpush.bf16.msrb.mxu2 %v426_v34  ;;  %v769_v33 = vpack.c.bf16 %v763_v32, %v762_v31  ;;  %v614_v34 = vmul.f32 %v1892_v5, %v1892_v5  ;;  %v913_v32 = vmul.f32 %v1947_v41, %v1898_v7 }
  0xd0   : > { %v361_v44 = vpop.f32.mrf.mxu0 }
  0xd1   : > { %v372_v46 = vpack.c.bf16 %v361_v44, %v361_v44  ;;  %v764_v44 = vmul.f32 %v1947_v41, %v1947_v41 }
  0xd2   : > { %1555 = vmatmul.msk.bf16.vlgmr.msrb.gmra.mxu2 %vm324_vm0, %v1909_v18 }
  0xd3   : > { %493 = vmatpush.bf16.msra.mxu2 %v1862_v0  ;;  %v444_v49 = vunpack.c.l.b16 %v372_v46  ;;  %v765_v46 = vmul.f32 %v1949_v42, %v1949_v42 }
  0xd7   : > { %791 = vmatpush.bf16.msrb.mxu2 %v1862_v0 }
  0xd8   : > { %v363_v47 = vpop.f32.mrf.mxu0 }
  0xd9   : > { %v373_v48 = vpack.c.bf16 %v363_v47, %v363_v47 }
  0xdb   : > { %v445_v51 = vunpack.c.l.b16 %v373_v48  ;;  %v770_v48 = vpack.c.bf16 %v765_v46, %v764_v44 }
  0xdd   : > { %v446_v52 = vpack.c.b16 %v445_v51, %v444_v49  ;;  %v615_v49 = vmul.f32 %v1898_v7, %v1898_v7  ;;  %v616_v51 = vmul.f32 %v1901_v8, %v1901_v8 }
  0xdf   : > { %455 = vmatpush.bf16.msrb.mxu1 %v446_v52  ;;  %v621_v52 = vpack.c.bf16 %v616_v51, %v615_v49 }
  0xe2   : > { %1557 = vmatmul.msk.bf16.vlgmr.msra.gmra.mxu2 %vm324_vm0, %v470_v37  ;;  %1556 = vmatmul.msk.bf16.vlgmr.msrb.gmra.mxu1 %vm324_vm0, %v1909_v18  ;;  %v909_v37 = vmul.f32 %v1933_v35, %v1880_v1 }
  0xf2   : > { %1558 = vmatmul.msk.bf16.gmra.mxu2 %vm324_vm0, %v471_v40  ;;  %v910_v40 = vmul.f32 %v1935_v36, %v1883_v2 }
  0xf4   : > { %v917_v47 = vpack.c.bf16 %v910_v40, %v909_v37 }
 0x102   : > { %1559 = vmatmul.msk.bf16.gmra.mxu2 %vm324_vm0, %v472_v43 }
 0x112   : > { %1560 = vmatmul.msk.bf16.gmra.mxu2 %vm324_vm0, %v473_v60  ;;  %v617_v60 = vmul.f32 %v1916_v26, %v1916_v26 }
 0x122   : > { %1573 = vmatmul.msk.bf16.vlgmr.msrb.gmra.mxu2 %vm324_vm0, %v768_v30 }
 0x132   : > { %1574 = vmatmul.msk.bf16.gmra.mxu2 %vm324_vm0, %v769_v33  ;;  %v914_v33 = vmul.f32 %v1949_v42, %v1901_v8 }
 0x134   : > { %v919_v44 = vpack.c.bf16 %v914_v33, %v913_v32 }
 0x142   : > { %1575 = vmatmul.msk.bf16.gmra.mxu2 %vm324_vm0, %v770_v48 }
 0x145   : > { %v1954_v45 = vpop.f32.mrf.mxu2 }
 0x14d   : > { %v1956_v50 = vpop.f32.mrf.mxu2 }
 0x155   : > { %v1958_v53 = vpop.f32.mrf.mxu2 }
 0x15d   : > { %v1962_v54 = vpop.f32.mrf.mxu2 }
 0x165   : > { %v495_v55 = vpop.f32.mrf.mxu2 }
 0x166   : > { %v515_v56 = vpack.c.bf16 %v495_v55, %v495_v55  ;;  %v766_v55 = vmul.f32 %v1964_v57, %v1964_v57 }
 0x168   : > { %v525_v62 = vunpack.c.l.b16 %v515_v56  ;;  %v767_v56 = vmul.f32 %v1966_v58, %v1966_v58 }
 0x16d   : > { %v497_v59 = vpop.f32.mrf.mxu2 }
 0x16e   : > { %v516_v61 = vpack.c.bf16 %v497_v59, %v497_v59  ;;  %v771_v59 = vpack.c.bf16 %v767_v56, %v766_v55 }
 0x170   : > { %v526_v63 = vunpack.c.l.b16 %v516_v61  ;;  %v618_v61 = vmul.f32 %v1919_v27, %v1919_v27  ;;  %1576 = vmatmul.msk.bf16.gmra.mxu2 %vm324_vm0, %v771_v59 }
 0x172   : > { %v527_v3 = vpack.c.b16 %v526_v63, %v525_v62  ;;  %v622_v62 = vpack.c.bf16 %v618_v61, %v617_v60  ;;  %v397_v63 = vpop.f32.mrf.mxu1  ;;  %v915_v60 = vmul.f32 %v1964_v57, %v1916_v26  ;;  %v916_v61 = vmul.f32 %v1966_v58, %v1919_v27 }
 0x174   : > { %536 = vmatpush.bf16.msra.mxu3 %v527_v3 }
 0x175   : > { %v500_v10 = vpop.f32.mrf.mxu2 }
 0x176   : > { %v517_v12 = vpack.c.bf16 %v500_v10, %v500_v10  ;;  %v912_v10 = vmul.f32 %v1942_v39, %v1892_v5 }
 0x177   : > { %1561 = vmatmul.msk.bf16.vlgmr.msra.gmra.mxu3 %vm324_vm0, %v1909_v18 }
 0x178   : > { %v545_v15 = vunpack.c.l.b16 %v517_v12  ;;  %v918_v12 = vpack.c.bf16 %v912_v10, %v911_v9 }
 0x17a   : > { %v399_v3 = vpop.f32.mrf.mxu1 }
 0x17d   : > { %v502_v13 = vpop.f32.mrf.mxu2 }
 0x17e   : > { %v518_v14 = vpack.c.bf16 %v502_v13, %v502_v13  ;;  %v2033_v13 = vld [vmem:[%s2573_s4] sm:$0xff] }
 0x180   : > { %v546_v16 = vunpack.c.l.b16 %v518_v14  ;;  %v462_v14 = vmul.f32 %v397_v63, %v2033_v13  ;;  %v2099_v63 = vld [vmem:[%s2573_s4 + $0x20] sm:$0xff] }
 0x181   : > { %2598 = vst [vmem:[#allocation10_spill] sm:$0xff] %v2099_v63 }
 0x182   : > { %v547_v17 = vpack.c.b16 %v546_v16, %v545_v15  ;;  %v2024_v6 = vpop.f32.mrf.mxu1 }
 0x184   : > { %556 = vmatpush.bf16.msra.mxu1 %v547_v17 }
 0x185   : > { %v505_v19 = vpop.f32.mrf.mxu2 }
 0x186   : > { %v519_v20 = vpack.c.bf16 %v505_v19, %v505_v19  ;;  %v2039_v19 = vmul.f32 %v462_v14, %v462_v14 }
 0x187   : > { %1562 = vmatmul.msk.bf16.vlgmr.msra.gmra.mxu1 %vm324_vm0, %v1909_v18 }
 0x188   : > { %v565_v23 = vunpack.c.l.b16 %v519_v20  ;;  %v2044_v20 = vld [vmem:[%s2573_s4 + $0x8] sm:$0xff] }
 0x189   : > { %v463_v30 = vmul.f32 %v399_v3, %v2044_v20  ;;  %v466_v3 = vmul.f32 %v1958_v53, %v2099_v63 }
 0x18a   : > { %v2037_v15 = vpop.f32.mrf.mxu1 }
 0x18d   : > { %v507_v21 = vpop.f32.mrf.mxu2 }
 0x18e   : > { %v520_v22 = vpack.c.bf16 %v507_v21, %v507_v21 }
 0x190   : > { %v566_v24 = vunpack.c.l.b16 %v520_v22 }
 0x192   : > { %v567_v25 = vpack.c.b16 %v566_v24, %v565_v23 }
 0x194   : > { %576 = vmatpush.bf16.msrb.mxu3 %v567_v25 }
 0x197   : > { %1563 = vmatmul.msk.bf16.vlgmr.msrb.gmra.mxu3 %vm324_vm0, %v1909_v18 }
 0x198   : > { %642 = vmatpush.bf16.msra.mxu3 %v1862_v0 }
 0x19c   : > { %940 = vmatpush.bf16.msrb.mxu3 %v1862_v0  ;;  %v613_v0 = vmul.f32 %v1889_v4, %v1889_v4 }
 0x19e   : > { %v620_v43 = vpack.c.bf16 %v614_v34, %v613_v0  ;;  %v2063_v34 = vld [vmem:[%s2573_s4 + $0x10] sm:$0xff] }
 0x19f   : > { %v464_v40 = vmul.f32 %v1954_v45, %v2063_v34 }
 0x1a7   : > { %1565 = vmatmul.msk.bf16.vlgmr.msra.gmra.mxu3 %vm324_vm0, %v619_v11  ;;  %v510_v11 = vpop.f32.mrf.mxu2 }
 0x1a8   : > { %v521_v22 = vpack.c.bf16 %v510_v11, %v510_v11  ;;  %v2105_v11 = vmul.f32 %v466_v3, %v466_v3 }
 0x1aa   : > { %v585_v28 = vunpack.c.l.b16 %v521_v22  ;;  %2599 = vst [vmem:[#allocation11_spill] sm:$0xff] %v2105_v11 }
 0x1af   : > { %v512_v17 = vpop.f32.mrf.mxu2 }
 0x1b0   : > { %v522_v23 = vpack.c.bf16 %v512_v17, %v512_v17 }
 0x1b2   : > { %v586_v29 = vunpack.c.l.b16 %v522_v23 }
 0x1b4   : > { %v587_v0 = vpack.c.b16 %v586_v29, %v585_v28 }
 0x1b6   : > { %596 = vmatpush.bf16.msrb.mxu1 %v587_v0 }
 0x1b7   : > { %1566 = vmatmul.msk.bf16.gmra.mxu3 %vm324_vm0, %v620_v43  ;;  %v2067_v43 = vmul.f32 %v463_v30, %v463_v30  ;;  %v793_v22 = vpop.f32.mrf.mxu2 }
 0x1b9   : > { %1564 = vmatmul.msk.bf16.vlgmr.msrb.gmra.mxu1 %vm324_vm0, %v1909_v18 }
 0x1bf   : > { %v795_v0 = vpop.f32.mrf.mxu2 }
 0x1c7   : > { %1567 = vmatmul.msk.bf16.gmra.mxu3 %vm324_vm0, %v621_v52  ;;  %v2077_v52 = vmul.f32 %v464_v40, %v464_v40 }
 0x1d7   : > { %1568 = vmatmul.msk.bf16.gmra.mxu3 %vm324_vm0, %v622_v62  ;;  %v920_v62 = vpack.c.bf16 %v916_v61, %v915_v60 }
 0x1e7   : > { %1581 = vmatmul.msk.bf16.vlgmr.msrb.gmra.mxu3 %vm324_vm0, %v917_v47 }
 0x1f7   : > { %1582 = vmatmul.msk.bf16.gmra.mxu3 %vm324_vm0, %v918_v12 }
 0x1fa   : > { %v538_v16 = vpop.f32.mrf.mxu3 }
 0x1fb   : > { %v603_v21 = vmul.f32 %v538_v16, %v2033_v13  ;;  %v2114_v16 = vld [vmem:[%s2573_s4 + $0x28] sm:$0xff] }
 0x1fc   : > { %v467_v53 = vmul.f32 %v1962_v54, %v2114_v16 }
 0x1fd   : > { %v2047_v24 = vmul.f32 %v603_v21, %v603_v21  ;;  %v2049_v25 = vmul.f32 %v603_v21, %v462_v14 }
 0x1fe   : > { %v2123_v28 = vmul.f32 %v467_v53, %v467_v53 }
 0x1ff   : > { %v2054_v31 = vadd.f32 %v2047_v24, %v2039_v19 }
 0x200   : > { %2602 = vst [vmem:[#allocation14_spill] sm:$0xff] %v2123_v28 }
 0x202   : > { %v540_v37 = vpop.f32.mrf.mxu3 }
 0x203   : > { %v604_v46 = vmul.f32 %v540_v37, %v2044_v20 }
 0x204   : > { %v558_v47 = vpop.f32.mrf.mxu1 }
 0x205   : > { %v605_v48 = vmul.f32 %v558_v47, %v2063_v34  ;;  %v2073_v49 = vmul.f32 %v604_v46, %v604_v46  ;;  %v2075_v51 = vmul.f32 %v604_v46, %v463_v30 }
 0x207   : > { %v2079_v55 = vmul.f32 %v605_v48, %v605_v48  ;;  %v2081_v45 = vmul.f32 %v605_v48, %v464_v40  ;;  %1583 = vmatmul.msk.bf16.gmra.mxu3 %vm324_vm0, %v919_v44  ;;  %v2086_v56 = vadd.f32 %v2073_v49, %v2067_v43  ;;  %v798_v44 = vpop.f32.mrf.mxu2 }
 0x209   : > { %2596 = vst [vmem:[#allocation8_spill] sm:$0xff] %v2079_v55  ;;  %v2090_v59 = vadd.f32 %v2079_v55, %v2077_v52 }
 0x20a   : > { %2597 = vst [vmem:[#allocation9_spill] sm:$0xff] %v2081_v45 }
 0x20f   : > { %v800_v61 = vpop.f32.mrf.mxu2 }
 0x217   : > { %1584 = vmatmul.msk.bf16.gmra.mxu3 %vm324_vm0, %v920_v62 }
 0x21a   : > { %v578_v9 = vpop.f32.mrf.mxu3 }
 0x21b   : > { %v607_v10 = vmul.f32 %v578_v9, %v2099_v63  ;;  %v803_v9 = vpop.f32.mrf.mxu2 }
 0x21d   : > { %v2107_v12 = vmul.f32 %v607_v10, %v607_v10  ;;  %v2109_v14 = vmul.f32 %v607_v10, %v466_v3 }
 0x21f   : > { %2600 = vst [vmem:[#allocation12_spill] sm:$0xff] %v2107_v12  ;;  %v2118_v17 = vadd.f32 %v2107_v12, %v2105_v11 }
 0x220   : > { %2601 = vst [vmem:[#allocation13_spill] sm:$0xff] %v2109_v14 }
 0x222   : > { %v580_v21 = vpop.f32.mrf.mxu3 }
 0x223   : > { %v608_v23 = vmul.f32 %v580_v21, %v2114_v16 }
 0x225   : > { %v2125_v29 = vmul.f32 %v608_v23, %v608_v23  ;;  %v2127_v30 = vmul.f32 %v608_v23, %v467_v53 }
 0x227   : > { %2603 = vst [vmem:[#allocation15_spill] sm:$0xff] %v2125_v29  ;;  %v2131_v32 = vadd.f32 %v2125_v29, %v2123_v28 }
 0x228   : > { %2604 = vst [vmem:[#allocation16_spill] sm:$0xff] %v2127_v30  ;;  %v805_v30 = vpop.f32.mrf.mxu2 }
 0x22a   : > { %v644_v33 = vpop.f32.mrf.mxu3 }
 0x22b   : > { %v664_v37 = vpack.c.bf16 %v644_v33, %v644_v33 }
 0x22d   : > { %v674_v46 = vunpack.c.l.b16 %v664_v37  ;;  %v813_v37 = vpack.c.bf16 %v793_v22, %v793_v22 }
 0x230   : > { %v808_v55 = vpop.f32.mrf.mxu2 }
 0x232   : > { %v646_v40 = vpop.f32.mrf.mxu3 }
 0x233   : > { %v665_v54 = vpack.c.bf16 %v646_v40, %v646_v40  ;;  %v814_v40 = vpack.c.bf16 %v795_v0, %v795_v0  ;;  %v816_v0 = vpack.c.bf16 %v800_v61, %v800_v61 }
 0x235   : > { %v675_v47 = vunpack.c.l.b16 %v665_v54  ;;  %v824_v12 = vunpack.c.l.b16 %v814_v40 }
 0x237   : > { %v676_v48 = vpack.c.b16 %v675_v47, %v674_v46  ;;  %v817_v46 = vpack.c.bf16 %v803_v9, %v803_v9  ;;  %v818_v47 = vpack.c.bf16 %v805_v30, %v805_v30  ;;  %v815_v30 = vpack.c.bf16 %v798_v44, %v798_v44 }
 0x238   : > { %v810_v22 = vpop.f32.mrf.mxu2 }
 0x239   : > { %685 = vmatpush.bf16.msrb.mxu0 %v676_v48 }
 0x23a   : > { %v649_v60 = vpop.f32.mrf.mxu3 }
 0x23b   : > { %v666_v62 = vpack.c.bf16 %v649_v60, %v649_v60  ;;  %v823_v60 = vunpack.c.l.b16 %v813_v37  ;;  %v820_v37 = vpack.c.bf16 %v810_v22, %v810_v22 }
 0x23c   : > { %1569 = vmatmul.msk.bf16.vlgmr.msrb.gmra.mxu0 %vm324_vm0, %v1909_v18 }
 0x23d   : > { %v694_v53 = vunpack.c.l.b16 %v666_v62 }
 0x242   : > { %v651_v3 = vpop.f32.mrf.mxu3 }
 0x243   : > { %v667_v10 = vpack.c.bf16 %v651_v3, %v651_v3 }
 0x245   : > { %v695_v21 = vunpack.c.l.b16 %v667_v10  ;;  %v863_v10 = vunpack.c.l.b16 %v817_v46  ;;  %v844_v46 = vunpack.c.l.b16 %v816_v0 }
 0x247   : > { %v696_v23 = vpack.c.b16 %v695_v21, %v694_v53  ;;  %v864_v53 = vunpack.c.l.b16 %v818_v47 }
 0x249   : > { %705 = vmatpush.bf16.msra.mxu1 %v696_v23  ;;  %v825_v23 = vpack.c.b16 %v824_v12, %v823_v60  ;;  %v865_v28 = vpack.c.b16 %v864_v53, %v863_v10  ;;  %v884_v60 = vunpack.c.l.b16 %v820_v37  ;;  %v2157_v37 = vld [vmem:[%s2573_s4 + $0x38] sm:$0xff] }
 0x24a   : > { %v654_v33 = vpop.f32.mrf.mxu3 }
 0x24b   : > { %v668_v54 = vpack.c.bf16 %v654_v33, %v654_v33  ;;  %v819_v33 = vpack.c.bf16 %v808_v55, %v808_v55 }
 0x24c   : > { %1570 = vmatmul.msk.bf16.vlgmr.msra.gmra.mxu1 %vm324_vm0, %v1909_v18 }
 0x24d   : > { %v714_v3 = vunpack.c.l.b16 %v668_v54  ;;  %v843_v54 = vunpack.c.l.b16 %v815_v30 }
 0x252   : > { %v656_v48 = vpop.f32.mrf.mxu3 }
 0x253   : > { %v669_v29 = vpack.c.bf16 %v656_v48, %v656_v48  ;;  %v883_v48 = vunpack.c.l.b16 %v819_v33  ;;  %v2152_v33 = vld [vmem:[%s2573_s4 + $0x30] sm:$0xff] }
 0x255   : > { %v715_v62 = vunpack.c.l.b16 %v669_v29  ;;  %v885_v10 = vpack.c.b16 %v884_v60, %v883_v48 }
 0x257   : > { %v716_v21 = vpack.c.b16 %v715_v62, %v714_v3  ;;  %v845_v62 = vpack.c.b16 %v844_v46, %v843_v54  ;;  %v468_v46 = vmul.f32 %v2024_v6, %v2152_v33 }
 0x259   : > { %725 = vmatpush.bf16.msra.mxu0 %v716_v21  ;;  %v2163_v60 = vmul.f32 %v468_v46, %v468_v46 }
 0x25a   : > { %v659_v11 = vpop.f32.mrf.mxu3 }
 0x25b   : > { %v670_v9 = vpack.c.bf16 %v659_v11, %v659_v11 }
 0x25c   : > { %1571 = vmatmul.msk.bf16.vlgmr.msra.gmra.mxu0 %vm324_vm0, %v1909_v18 }
 0x25d   : > { %834 = vmatpush.bf16.msrb.mxu0 %v825_v23  ;;  %v734_v47 = vunpack.c.l.b16 %v670_v9  ;;  %v2143_v23 = vpop.f32.mrf.mxu1 }
 0x261   : > { %874 = vmatpush.bf16.msra.mxu0 %v865_v28 }
 0x262   : > { %v661_v40 = vpop.f32.mrf.mxu3 }
 0x263   : > { %v671_v29 = vpack.c.bf16 %v661_v40, %v661_v40 }
 0x265   : > { %v735_v12 = vunpack.c.l.b16 %v671_v29  ;;  %v598_v0 = vpop.f32.mrf.mxu1 }
 0x267   : > { %v736_v3 = vpack.c.b16 %v735_v12, %v734_v47  ;;  %v469_v47 = vmul.f32 %v2037_v15, %v2157_v37 }
 0x269   : > { %745 = vmatpush.bf16.msrb.mxu1 %v736_v3  ;;  %v2165_v3 = vmul.f32 %v469_v47, %v469_v47 }
 0x26a   : > { %v942_v53 = vpop.f32.mrf.mxu3 }
 0x26b   : > { %v962_v55 = vpack.c.bf16 %v942_v53, %v942_v53 }
 0x26c   : > { %1572 = vmatmul.msk.bf16.vlgmr.msrb.gmra.mxu1 %vm324_vm0, %v1909_v18  ;;  %1577 = vmatmul.msk.bf16.vlgmr.msrb.gmra.mxu0 %vm324_vm0, %v1909_v18 }
 0x26d   : > { %854 = vmatpush.bf16.msra.mxu1 %v845_v62  ;;  %v972_v44 = vunpack.c.l.b16 %v962_v55  ;;  %v600_v48 = vpop.f32.mrf.mxu1 }
 0x26e   : > { %v610_v53 = vmul.f32 %v600_v48, %v2157_v37 }
 0x270   : > { %v2177_v55 = vmul.f32 %v610_v53, %v610_v53 }
 0x271   : > { %894 = vmatpush.bf16.msrb.mxu1 %v885_v10  ;;  %v609_v10 = vmul.f32 %v598_v0, %v2152_v33 }
 0x272   : > { %v944_v11 = vpop.f32.mrf.mxu3 }
 0x273   : > { %v963_v28 = vpack.c.bf16 %v944_v11, %v944_v11  ;;  %v2173_v6 = vmul.f32 %v609_v10, %v609_v10  ;;  %v2175_v15 = vmul.f32 %v609_v10, %v468_v46  ;;  %v2179_v11 = vmul.f32 %v610_v53, %v469_v47 }
 0x275   : > { %v973_v61 = vunpack.c.l.b16 %v963_v28  ;;  %2605 = vst [vmem:[#allocation17_spill] sm:$0xff] %v2175_v15  ;;  %v2183_v28 = vadd.f32 %v2173_v6, %v2163_v60 }
 0x276   : > { %2606 = vst [vmem:[#allocation18_spill] sm:$0xff] %v2179_v11 }
 0x277   : > { %v974_v21 = vpack.c.b16 %v973_v61, %v972_v44  ;;  %v2187_v44 = vadd.f32 %v2177_v55, %v2165_v3 }
 0x279   : > { %983 = vmatpush.bf16.msrb.mxu0 %v974_v21 }
 0x27a   : > { %v947_v22 = vpop.f32.mrf.mxu3 }
 0x27b   : > { %v964_v30 = vpack.c.bf16 %v947_v22, %v947_v22 }
 0x27c   : > { %1578 = vmatmul.msk.bf16.vlgmr.msra.gmra.mxu1 %vm324_vm0, %v1909_v18  ;;  %1579 = vmatmul.msk.bf16.vlgmr.msra.gmra.mxu0 %vm324_vm0, %v1909_v18 }
 0x27d   : > { %v992_v29 = vunpack.c.l.b16 %v964_v30 }
 0x282   : > { %v949_v9 = vpop.f32.mrf.mxu3 }
 0x283   : > { %v965_v40 = vpack.c.bf16 %v949_v9, %v949_v9 }
 0x285   : > { %v993_v54 = vunpack.c.l.b16 %v965_v40 }
 0x287   : > { %v994_v12 = vpack.c.b16 %v993_v54, %v992_v29 }
 0x289   : > { %1003 = vmatpush.bf16.msra.mxu1 %v994_v12 }
 0x28a   : > { %v952_v62 = vpop.f32.mrf.mxu3 }
 0x28b   : > { %v966_v61 = vpack.c.bf16 %v952_v62, %v952_v62 }
 0x28c   : > { %1580 = vmatmul.msk.bf16.vlgmr.msrb.gmra.mxu1 %vm324_vm0, %v1909_v18  ;;  %1585 = vmatmul.msk.bf16.vlgmr.msrb.gmra.mxu0 %vm324_vm0, %v1909_v18 }
 0x28d   : > { %v1012_v30 = vunpack.c.l.b16 %v966_v61 }
 0x292   : > { %v954_v21 = vpop.f32.mrf.mxu3 }
 0x293   : > { %v967_v22 = vpack.c.bf16 %v954_v21, %v954_v21 }
 0x295   : > { %v1013_v0 = vunpack.c.l.b16 %v967_v22 }
 0x297   : > { %v1014_v9 = vpack.c.b16 %v1013_v0, %v1012_v30 }
 0x299   : > { %1023 = vmatpush.bf16.msra.mxu0 %v1014_v9  ;;  %v1155_v9 = vadd.f32 0.0001, %v2086_v56 }
 0x29a   : > { %v957_v40 = vpop.f32.mrf.mxu3 }
 0x29b   : > { %v968_v29 = vpack.c.bf16 %v957_v40, %v957_v40 }
 0x29c   : > { %1586 = vmatmul.msk.bf16.vlgmr.msra.gmra.mxu1 %vm324_vm0, %v1909_v18  ;;  %1587 = vmatmul.msk.bf16.vlgmr.msra.gmra.mxu0 %vm324_vm0, %v1909_v18 }
 0x29d   : > { %v1032_v47 = vunpack.c.l.b16 %v968_v29 }
 0x2a2   : > { %v959_v54 = vpop.f32.mrf.mxu3 }
 0x2a3   : > { %v969_v46 = vpack.c.bf16 %v959_v54, %v959_v54 }
 0x2a5   : > { %v1033_v12 = vunpack.c.l.b16 %v969_v46  ;;  %v1206_v46 = vsub.f32 %v1898_v7, %v1947_v41  ;;  %v1209_v7 = vsub.f32 %v1919_v27, %v1966_v58  ;;  %v1107_v27 = vmul.f32 2.0, %v2075_v51 }
 0x2a6   : > { %v1154_v58 = vadd.f32 0.0001, %v2054_v31 }
 0x2a7   : > { %v1034_v48 = vpack.c.b16 %v1033_v12, %v1032_v47  ;;  %v1202_v12 = vsub.f32 %v1880_v1, %v1933_v35  ;;  %v1207_v1 = vsub.f32 %v1901_v8, %v1949_v42  ;;  %v1208_v35 = vsub.f32 %v1916_v26, %v1964_v57 }
 0x2a8   : > { %v1214_v26 = vmul.f32 %v1206_v46, %v1206_v46 }
 0x2a9   : > { %1043 = vmatpush.bf16.msrb.mxu1 %v1034_v48  ;;  %v1215_v41 = vmul.f32 %v1207_v1, %v1207_v1  ;;  %v1216_v42 = vmul.f32 %v1208_v35, %v1208_v35 }
 0x2ab   : > { %v2261_v1 = vadd.f32 1e-06, %v1215_v41  ;;  %v2263_v35 = vadd.f32 1e-06, %v1216_v42  ;;  %v2274_v41 = vadd.f32 0.0001, %v1107_v27 }
 0x2ac   : > { %1588 = vmatmul.msk.bf16.vlgmr.msrb.gmra.mxu1 %vm324_vm0, %v1909_v18  ;;  %v2208_v18 = vld [vmem:[%s2573_s4 + $0x18] sm:$0xff] }
 0x2ad   : > { %vm1293_vm11 = vcmp.eq.f32.partialorder %v2261_v1, inf  ;;  %vm1295_vm12 = vcmp.eq.f32.partialorder %v2261_v1, 0.0  ;;  %vm1305_vm13 = vcmp.eq.f32.partialorder %v2263_v35, inf  ;;  %vm1307_vm14 = vcmp.eq.f32.partialorder %v2263_v35, 0.0 }
 0x2b9   : > { %v687_v62 = vpop.f32.mrf.mxu0 }
 0x2ba   : > { %v752_v10 = vmul.f32 %v687_v62, %v2033_v13  ;;  %v1203_v62 = vsub.f32 %v1883_v2, %v1935_v36  ;;  %v606_v2 = vmul.f32 %v2143_v23, %v2208_v18 }
 0x2bc   : > { %v1082_v53 = vsub.f32 %v752_v10, %v2039_v19  ;;  %v465_v19 = vmul.f32 %v1956_v50, %v2208_v18  ;;  %v1210_v10 = vmul.f32 %v1202_v12, %v1202_v12  ;;  %v1204_v50 = vsub.f32 %v1889_v4, %v1940_v38 }
 0x2bd   : > { %v2248_v57 = vmul.f32 %v606_v2, %v606_v2 }
 0x2be   : > { %v2214_v29 = vmul.f32 %v465_v19, %v465_v19 }
 0x2c1   : > { %v689_v61 = vpop.f32.mrf.mxu0 }
 0x2c2   : > { %v2198_v21 = vmul.f32 %v689_v61, %v2044_v20  ;;  %v1211_v61 = vmul.f32 %v1203_v62, %v1203_v62 }
 0x2c4   : > { %v2241_v38 = vadd.f32 1e-06, %v1211_v61  ;;  %v1217_v61 = vmul.f32 %v1209_v7, %v1209_v7  ;;  %v2610_v56 = vsub.f32 %v2198_v21, %v2067_v43  ;;  %v2611_v43 = vld [vmem:[#allocation11_spill] sm:$0xff] }
 0x2c6   : > { %vm1245_vm2 = vcmp.eq.f32.partialorder %v2241_v38, inf  ;;  %vm1247_vm4 = vcmp.eq.f32.partialorder %v2241_v38, 0.0 }
 0x2c9   : > { %v707_v30 = vpop.f32.mrf.mxu1 }
 0x2ca   : > { %v2203_v0 = vmul.f32 %v707_v30, %v2063_v34  ;;  %v1205_v30 = vsub.f32 %v1892_v5, %v1942_v39  ;;  %v1212_v5 = vmul.f32 %v1204_v50, %v1204_v50  ;;  %v1106_v50 = vmul.f32 2.0, %v2049_v25 }
 0x2cc   : > { %v1213_v12 = vmul.f32 %v1205_v30, %v1205_v30  ;;  %v2251_v23 = vadd.f32 1e-06, %v1212_v5  ;;  %v2259_v30 = vadd.f32 1e-06, %v1214_v26  ;;  %v2272_v26 = vadd.f32 0.0001, %v1106_v50 }
 0x2ce   : > { %vm1257_vm5 = vcmp.eq.f32.partialorder %v2251_v23, inf  ;;  %vm1259_vm6 = vcmp.eq.f32.partialorder %v2251_v23, 0.0  ;;  %vm1281_vm9 = vcmp.eq.f32.partialorder %v2259_v30, inf  ;;  %vm1283_vm10 = vcmp.eq.f32.partialorder %v2259_v30, 0.0 }
 0x2d1   : > { %v709_v40 = vpop.f32.mrf.mxu1 }
 0x2d2   : > { %v2217_v54 = vmul.f32 %v709_v40, %v2208_v18  ;;  %v2229_v40 = vadd.f32 1e-06, %v1210_v10  ;;  %v2253_v10 = vadd.f32 1e-06, %v1213_v12  ;;  %v1110_v12 = vmul.f32 2.0, %v2109_v14 }
 0x2d4   : > { %1648 = vrsqrt.f32 %v2229_v40  ;;  %v2290_v27 = vadd.f32 0.0001, %v1110_v12  ;;  %vm1233_vm1 = vcmp.eq.f32.partialorder %v2229_v40, inf  ;;  %vm1235_vm3 = vcmp.eq.f32.partialorder %v2229_v40, 0.0 }
 0x2d5   : > { %1650 = vrsqrt.f32 %v2241_v38  ;;  %vm1269_vm7 = vcmp.eq.f32.partialorder %v2253_v10, inf  ;;  %vm1271_vm8 = vcmp.eq.f32.partialorder %v2253_v10, 0.0 }
 0x2d6   : > { %1652 = vrsqrt.f32 %v2251_v23  ;;  %2609 = vst [vmem:[#allocation21_spill] sm:$0xff] %v2290_v27 }
 0x2d7   : > { %1654 = vrsqrt.f32 %v2253_v10 }
 0x2d8   : > { %1656 = vrsqrt.f32 %v2259_v30 }
 0x2d9   : > { %v727_v47 = vpop.f32.mrf.mxu0  ;;  %1658 = vrsqrt.f32 %v2261_v1 }
 0x2da   : > { %v756_v22 = vmul.f32 %v727_v47, %v2099_v63 }
 0x2e1   : > { %v729_v48 = vpop.f32.mrf.mxu0 }
 0x2e9   : > { %v2239_v36 = vpop.f32.mrf.mxu1  ;;  %v836_v4 = vpop.f32.mrf.mxu0 }
 0x2ea   : > { %v901_v39 = vmul.f32 %v836_v4, %v2033_v13  ;;  %v2314_v27 = vmul.f32 %v2239_v36, %v2152_v33 }
 0x2ec   : > { %v1090_v8 = vsub.f32 %v901_v39, %v2047_v24  ;;  %v1108_v24 = vmul.f32 2.0, %v2081_v45  ;;  %v1649_v39 = vpop.eup %1648 }
 0x2ed   : > { %v1651_v42 = vpop.eup %1650 }
 0x2ee   : > { %v1162_v62 = vadd.f32 %v1090_v8, %v1082_v53  ;;  %v1149_v53 = vadd.f32 %v2248_v57, %v2214_v29  ;;  %v2270_v8 = vadd.f32 1e-06, %v1217_v61  ;;  %v2285_v61 = vmul.f32 %v729_v48, %v2114_v16  ;;  %v1653_v48 = vpop.eup %1652 }
 0x2ef   : > { %v1239_v47 = vmul.f32 %v1651_v42, %v2241_v38  ;;  %v1251_v15 = vmul.f32 %v1653_v48, %v2251_v23 }
 0x2f0   : > { %v1170_v46 = vadd.f32 0.0009, %v1162_v62  ;;  %v2276_v62 = vadd.f32 0.0001, %v1108_v24  ;;  %v2288_v50 = vadd.f32 0.0001, %v1149_v53 }
 0x2f1   : > { %v749_v4 = vpop.f32.mrf.mxu1  ;;  %v838_v5 = vpop.f32.mrf.mxu0  ;;  %v2306_v53 = vadd.f32 0.0001, %v2187_v44  ;;  %vm1317_vm15 = vcmp.eq.f32.partialorder %v2270_v8, inf }
 0x2f2   : > { %v1178_v7 = vmul.f32 %v1170_v46, %v1154_v58  ;;  %v902_v31 = vmul.f32 %v838_v5, %v2044_v20  ;;  %2607 = vst [vmem:[#allocation19_spill] sm:$0xff] %v2276_v62  ;;  %v1156_v58 = vadd.f32 0.0001, %v2090_v59  ;;  %v2282_v46 = vmul.f32 %v606_v2, %v465_v19  ;;  %v2612_v5 = vld [vmem:[#allocation14_spill] sm:$0xff] }
 0x2f3   : > { %v2298_v59 = vadd.f32 0.0001, %v2131_v32  ;;  %v1227_v19 = vmul.f32 %v1649_v39, %v2229_v40  ;;  %v2303_v2 = vadd.f32 0.0001, %v2183_v28 }
 0x2f4   : > { %v1091_v11 = vsub.f32 %v902_v31, %v2073_v49  ;;  %2608 = vst [vmem:[#allocation20_spill] sm:$0xff] %v2282_v46  ;;  %v1158_v49 = vadd.f32 0.0001, %v2118_v17  ;;  %v1087_v17 = vsub.f32 %v2285_v61, %v2612_v5  ;;  %v1252_v61 = vmul.f32 %v1653_v48, %v1251_v15  ;;  %v2613_v5 = vld [vmem:[#allocation8_spill] sm:$0xff] }
 0x2f5   : > { %v1228_v31 = vmul.f32 %v1649_v39, %v1227_v19  ;;  %v2614_v46 = vld [vmem:[#allocation12_spill] sm:$0xff]  ;;  %1660 = vrcp.f32 %v1178_v7 }
 0x2f6   : > { %v1163_v24 = vadd.f32 %v1091_v11, %v2610_v56  ;;  %v1086_v11 = vsub.f32 %v756_v22, %v2611_v43  ;;  %v1240_v56 = vmul.f32 %v1651_v42, %v1239_v47  ;;  %v2318_v22 = vpop.eup %1654  ;;  %v2324_v47 = vmul.f32 %v749_v4, %v2157_v37 }
 0x2f7   : > { %v2321_v19 = vpop.eup %1656  ;;  %v1253_v14 = vmul.f32 0.5, %v1252_v61  ;;  %v2615_v4 = vsub.f32 %v2203_v0, %v2077_v52  ;;  %1662 = vrsqrt.f32 %v2263_v35 }
 0x2f8   : > { %v1171_v21 = vadd.f32 0.0009, %v1163_v24  ;;  %v1229_v24 = vmul.f32 0.5, %v1228_v31  ;;  %v1241_v43 = vmul.f32 0.5, %v1240_v56  ;;  %v1275_v15 = vmul.f32 %v2321_v19, %v2259_v30 }
 0x2f9   : > { %v856_v12 = vpop.f32.mrf.mxu1  ;;  %v876_v32 = vpop.f32.mrf.mxu0 }
 0x2fa   : > { %v1179_v28 = vmul.f32 %v1171_v21, %v1155_v9  ;;  %v903_v44 = vmul.f32 %v856_v12, %v2063_v34  ;;  %v905_v62 = vmul.f32 %v876_v32, %v2099_v63  ;;  %v1263_v21 = vmul.f32 %v2318_v22, %v2253_v10  ;;  %v2341_v63 = vpop.eup %1658 }
 0x2fb   : > { %v1230_v12 = vsub.f32 1.5, %v1229_v24  ;;  %v1242_v32 = vsub.f32 1.5, %v1241_v43  ;;  %v1089_v24 = vsub.f32 %v2324_v47, %v2165_v3 }
 0x2fc   : > { %v1092_v36 = vsub.f32 %v903_v44, %v2613_v5  ;;  %v1094_v9 = vsub.f32 %v905_v62, %v2614_v46  ;;  %v1254_v46 = vsub.f32 1.5, %v1253_v14  ;;  %v1264_v45 = vmul.f32 %v2318_v22, %v1263_v21 }
 0x2fd   : > { %v1231_v5 = vmul.f32 %v1649_v39, %v1230_v12  ;;  %v1243_v62 = vmul.f32 %v1651_v42, %v1242_v32  ;;  %1664 = vrcp.f32 %v1179_v28  ;;  %v1276_v39 = vmul.f32 %v2321_v19, %v1275_v15  ;;  %v2350_v28 = vpop.eup %1660 }
 0x2fe   : > { %v1164_v56 = vadd.f32 %v1092_v36, %v2615_v4  ;;  %v1166_v44 = vadd.f32 %v1094_v9, %v1086_v11  ;;  %v1255_v0 = vmul.f32 %v1653_v48, %v1254_v46  ;;  %v1265_v21 = vmul.f32 0.5, %v1264_v45  ;;  %v2616_v48 = vld [vmem:[#allocation15_spill] sm:$0xff]  ;;  %v2359_v45 = vpop.eup %1662 }
 0x2ff   : > { %v1232_v52 = vmul.f32 %v1231_v5, %v2229_v40  ;;  %v1244_v9 = vmul.f32 %v1243_v62, %v2241_v38  ;;  %1666 = vrsqrt.f32 %v2270_v8  ;;  %v1277_v15 = vmul.f32 0.5, %v1276_v39 }
 0x300   : > { %v1172_v43 = vadd.f32 0.0009, %v1164_v56  ;;  %v1174_v61 = vadd.f32 0.0009, %v1166_v44  ;;  %v1256_v44 = vmul.f32 %v1255_v0, %v2251_v23  ;;  %v1266_v46 = vsub.f32 1.5, %v1265_v21 }
 0x301   : > { %v858_v7 = vpop.f32.mrf.mxu1  ;;  %v878_v31 = vpop.f32.mrf.mxu0  ;;  %v1234_v56 = vsel %vm1233_vm1, %v2229_v40, %v1232_v52  ;;  %v1246_v62 = vsel %vm1245_vm2, %v2241_v38, %v1244_v9  ;;  %v1260_v0 = vand.u32 2147483648, %v2251_v23  ;;  %vm1319_vm1 = vcmp.eq.f32.partialorder %v2270_v8, 0.0 }
 0x302   : > { %v1180_v14 = vmul.f32 %v1172_v43, %v1156_v58  ;;  %v1182_v42 = vmul.f32 %v1174_v61, %v1158_v49  ;;  %v904_v11 = vmul.f32 %v858_v7, %v2208_v18  ;;  %v906_v36 = vmul.f32 %v878_v31, %v2114_v16 }
 0x303   : > { %v1287_v58 = vmul.f32 %v2341_v63, %v2261_v1  ;;  %v1236_v49 = vand.u32 2147483648, %v2229_v40  ;;  %v2617_v31 = vsub.f32 %v2217_v54, %v2214_v29  ;;  %v2368_v5 = vpop.eup %1664  ;;  %v1248_v29 = vand.u32 2147483648, %v2241_v38 }
 0x304   : > { %v1093_v12 = vsub.f32 %v904_v11, %v2248_v57  ;;  %v1095_v32 = vsub.f32 %v906_v36, %v2616_v48  ;;  %1668 = vrcp.f32 %v1180_v14  ;;  %v1258_v52 = vsel %vm1257_vm5, %v2251_v23, %v1256_v44 }
 0x305   : > { %v2375_v54 = vpop.eup %1666  ;;  %v1267_v39 = vmul.f32 %v2318_v22, %v1266_v46  ;;  %1670 = vrcp.f32 %v1182_v42  ;;  %v1272_v48 = vand.u32 2147483648, %v2253_v10  ;;  %v1278_v22 = vsub.f32 1.5, %v1277_v15 }
 0x306   : > { %v1165_v4 = vadd.f32 %v1093_v12, %v2617_v31  ;;  %v1167_v57 = vadd.f32 %v1095_v32, %v1087_v17  ;;  %v2402_v42 = vsel %vm1259_vm6, %v1260_v0, %v1258_v52  ;;  %v1288_v38 = vmul.f32 %v2341_v63, %v1287_v58 }
 0x307   : > { %v1268_v12 = vmul.f32 %v1267_v39, %v2253_v10  ;;  %v1311_v52 = vmul.f32 %v2375_v54, %v2270_v8  ;;  %v1308_v39 = vand.u32 2147483648, %v2263_v35 }
 0x308   : > { %v1173_v43 = vadd.f32 0.0009, %v1165_v4  ;;  %v1175_v61 = vadd.f32 0.0009, %v1167_v57  ;;  %v1284_v4 = vand.u32 2147483648, %v2259_v30 }
 0x309   : > { %v896_v17 = vpop.f32.mrf.mxu1  ;;  %v985_v7 = vpop.f32.mrf.mxu0  ;;  %v1270_v15 = vsel %vm1269_vm7, %v2253_v10, %v1268_v12  ;;  %v1312_v12 = vmul.f32 %v2375_v54, %v1311_v52 }
 0x30a   : > { %v2382_v14 = vmul.f32 %v1173_v43, %v2288_v50  ;;  %v2385_v11 = vmul.f32 %v1175_v61, %v2298_v59  ;;  %v907_v36 = vmul.f32 %v896_v17, %v2152_v33  ;;  %v1050_v9 = vmul.f32 %v985_v7, %v2033_v13  ;;  %v2389_v21 = vpop.eup %1668 }
 0x30b   : > { %v1237_v59 = vsel %vm1235_vm3, %v1236_v49, %v1234_v56  ;;  %v1249_v13 = vsel %vm1247_vm4, %v1248_v29, %v1246_v62  ;;  %v2413_v31 = vsel %vm1271_vm8, %v1272_v48, %v1270_v15  ;;  %v1296_v62 = vand.u32 2147483648, %v2261_v1 }
 0x30c   : > { %v1096_v32 = vsub.f32 %v907_v36, %v2173_v6  ;;  %v1098_v50 = vsub.f32 %v1050_v9, %v2049_v25  ;;  %v1279_v6 = vmul.f32 %v2321_v19, %v1278_v22  ;;  %v2618_v25 = vsub.f32 %v2314_v27, %v2163_v60  ;;  %v2420_v27 = vpop.eup %1670 }
 0x30d   : > { %v1289_v19 = vmul.f32 0.5, %v1288_v38  ;;  %v1299_v60 = vmul.f32 %v2359_v45, %v2263_v35  ;;  %v1323_v15 = vsel %vm324_vm0, %v1249_v13, 0.0  ;;  %1672 = vrcp.f32 %v2382_v14 }
 0x30e   : > { %v1168_v40 = vadd.f32 %v1096_v32, %v2618_v25  ;;  %v1122_v49 = vmul.f32 2.0, %v1098_v50  ;;  %v1280_v23 = vmul.f32 %v1279_v6, %v2259_v30  ;;  %v1313_v32 = vmul.f32 0.5, %v1312_v12 }
 0x30f   : > { %v1290_v17 = vsub.f32 1.5, %v1289_v19  ;;  %v1300_v7 = vmul.f32 %v2359_v45, %v1299_v60  ;;  %v1322_v50 = vsel %vm324_vm0, %v1237_v59, 0.0  ;;  %v2619_v59 = vld [vmem:[#allocation10_spill] sm:$0xff]  ;;  %v2620_v60 = vld [vmem:[#allocation9_spill] sm:$0xff]  ;;  %1674 = vrcp.f32 %v2385_v11 }
 0x310   : > { %v1176_v10 = vadd.f32 0.0009, %v1168_v40  ;;  %v1130_v57 = vadd.f32 0.0009, %v1122_v49  ;;  %v1282_v58 = vsel %vm1281_vm9, %v2259_v30, %v1280_v23  ;;  %v1324_v40 = vadd.f32 %v1323_v15, %v1322_v50  ;;  %v2626_v11 = vld [vmem:[#allocation17_spill] sm:$0xff] }
 0x311   : > { %v898_v56 = vpop.f32.mrf.mxu1  ;;  %v987_v44 = vpop.f32.mrf.mxu0  ;;  %v1291_v36 = vmul.f32 %v2341_v63, %v1290_v17  ;;  %v1301_v9 = vmul.f32 0.5, %v1300_v7 }
 0x312   : > { %v2427_v46 = vmul.f32 %v1176_v10, %v2303_v2  ;;  %v1138_v43 = vmul.f32 %v1130_v57, %v2272_v26  ;;  %v908_v61 = vmul.f32 %v898_v56, %v2157_v37  ;;  %v1051_v29 = vmul.f32 %v987_v44, %v2044_v20  ;;  %v2621_v56 = vld [vmem:[#allocation13_spill] sm:$0xff] }
 0x313   : > { %v1285_v20 = vsel %vm1283_vm10, %v1284_v4, %v1282_v58  ;;  %v1320_v57 = vand.u32 2147483648, %v2270_v8 }
 0x314   : > { %v1194_v0 = vmul.f32 %v2350_v28, %v1138_v43  ;;  %v1097_v2 = vsub.f32 %v908_v61, %v2177_v55  ;;  %v1099_v26 = vsub.f32 %v1051_v29, %v2075_v51  ;;  %v1292_v51 = vmul.f32 %v1291_v36, %v2261_v1 }
 0x315   : > { %v1302_v55 = vsub.f32 1.5, %v1301_v9  ;;  %v1327_v43 = vsel %vm324_vm0, %v2413_v31, 0.0  ;;  %v1329_v7 = vsel %vm324_vm0, %v1285_v20, 0.0  ;;  %1676 = vrcp.f32 %v2427_v46 }
 0x316   : > { %v1357_v48 = vsel %vm324_vm0, %v1194_v0, 0.0  ;;  %v1169_v28 = vadd.f32 %v1097_v2, %v1089_v24  ;;  %v1123_v22 = vmul.f32 2.0, %v1099_v26  ;;  %v1294_v3 = vsel %vm1293_vm11, %v2261_v1, %v1292_v51  ;;  %v2622_v26 = vld [vmem:[#allocation20_spill] sm:$0xff] }
 0x317   : > { %v1303_v47 = vmul.f32 %v2359_v45, %v1302_v55  ;;  %v1314_v24 = vsub.f32 1.5, %v1313_v32  ;;  %v1325_v45 = vsel %vm324_vm0, %v2402_v42, 0.0  ;;  %v1109_v36 = vmul.f32 2.0, %v2622_v26  ;;  %v2625_v32 = vld [vmem:[#allocation16_spill] sm:$0xff] }
 0x318   : > { %v1177_v30 = vadd.f32 0.0009, %v1169_v28  ;;  %v1131_v63 = vadd.f32 0.0009, %v1123_v22  ;;  %v1326_v58 = vadd.f32 %v1325_v45, %v1324_v40  ;;  %v2624_v22 = vld [vmem:[#allocation21_spill] sm:$0xff]  ;;  %v1112_v45 = vmul.f32 2.0, %v2626_v11 }
 0x319   : > { %v1005_v6 = vpop.f32.mrf.mxu1  ;;  %v1025_v25 = vpop.f32.mrf.mxu0  ;;  %v1304_v13 = vmul.f32 %v1303_v47, %v2263_v35  ;;  %v1315_v10 = vmul.f32 %v2375_v54, %v1314_v24  ;;  %v1117_v24 = vadd.f32 0.0001, %v1109_v36 }
 0x31a   : > { %v2459_v49 = vmul.f32 %v1177_v30, %v2306_v53  ;;  %v1139_v38 = vmul.f32 %v1131_v63, %v2274_v41  ;;  %v1052_v23 = vmul.f32 %v1005_v6, %v2063_v34  ;;  %v1054_v4 = vmul.f32 %v1025_v25, %v2619_v59 }
 0x31b   : > { %v1297_v34 = vsel %vm1295_vm12, %v1296_v62, %v1294_v3  ;;  %v1306_v41 = vsel %vm1305_vm13, %v2263_v35, %v1304_v13  ;;  %v1316_v54 = vmul.f32 %v1315_v10, %v2270_v8  ;;  %v1328_v62 = vadd.f32 %v1327_v43, %v1326_v58 }
 0x31c   : > { %v1195_v19 = vmul.f32 %v2368_v5, %v1139_v38  ;;  %v1100_v53 = vsub.f32 %v1052_v23, %v2620_v60  ;;  %v1102_v44 = vsub.f32 %v1054_v4, %v2621_v56  ;;  %v1309_v29 = vsel %vm1307_vm14, %v1308_v39, %v1306_v41 }
 0x31d   : > { %v1318_v1 = vsel %vm1317_vm15, %v2270_v8, %v1316_v54  ;;  %v1331_v2 = vsel %vm324_vm0, %v1297_v34, 0.0  ;;  %v1330_v39 = vadd.f32 %v1329_v7, %v1328_v62  ;;  %v1333_v12 = vsel %vm324_vm0, %v1309_v29, 0.0 }
 0x31e   : > { %v1358_v42 = vsel %vm324_vm0, %v1195_v19, 0.0  ;;  %v1124_v5 = vmul.f32 2.0, %v1100_v53  ;;  %v1126_v61 = vmul.f32 2.0, %v1102_v44  ;;  %v1321_v31 = vsel %vm1319_vm1, %v1320_v57, %v1318_v1  ;;  %v2627_v1 = vld [vmem:[#allocation18_spill] sm:$0xff] }
 0x31f   : > { %v1359_v17 = vadd.f32 %v1358_v42, %v1357_v48  ;;  %v2623_v48 = vld [vmem:[#allocation19_spill] sm:$0xff]  ;;  %v1111_v8 = vmul.f32 2.0, %v2625_v32  ;;  %v1332_v30 = vadd.f32 %v1331_v2, %v1330_v39  ;;  %v1335_v63 = vsel %vm324_vm0, %v1321_v31, 0.0 }
 0x320   : > { %v1132_v52 = vadd.f32 0.0009, %v1124_v5  ;;  %v1134_v0 = vadd.f32 0.0009, %v1126_v61  ;;  %v1120_v41 = vadd.f32 0.0001, %v1112_v45  ;;  %1678 = vrcp.f32 %v2459_v49 }
 0x321   : > { %v1007_v9 = vpop.f32.mrf.mxu1  ;;  %v1027_v35 = vpop.f32.mrf.mxu0  ;;  %v1119_v38 = vadd.f32 0.0001, %v1111_v8  ;;  %v1113_v62 = vmul.f32 2.0, %v2627_v1 }
 0x322   : > { %v1140_v28 = vmul.f32 %v1132_v52, %v2623_v48  ;;  %v1142_v51 = vmul.f32 %v1134_v0, %v2624_v22  ;;  %v1053_v20 = vmul.f32 %v1007_v9, %v2208_v18  ;;  %v1055_v55 = vmul.f32 %v1027_v35, %v2114_v16 }
 0x323   : > { %v1334_v18 = vadd.f32 %v1333_v12, %v1332_v30  ;;  %v1121_v2 = vadd.f32 0.0001, %v1113_v62  ;;  %v1778_v12 = vmov 1024.0  }
 0x324   : > { %v1196_v50 = vmul.f32 %v2389_v21, %v1140_v28  ;;  %v1198_v15 = vmul.f32 %v2420_v27, %v1142_v51  ;;  %v1101_v6 = vsub.f32 %v1053_v20, %v2622_v26  ;;  %v1103_v25 = vsub.f32 %v1055_v55, %v2625_v32  ;;  %v1673_v21 = vpop.eup %1672 }
 0x325   : > { %v1336_v40 = vadd.f32 %v1335_v63, %v1334_v18  ;;  %v1675_v57 = vpop.eup %1674  ;;  %1680 = vrcp.f32 %v1778_v12 }
 0x326   : > { %v1360_v16 = vsel %vm324_vm0, %v1196_v50, 0.0  ;;  %v1125_v3 = vmul.f32 2.0, %v1101_v6  ;;  %v1127_v47 = vmul.f32 2.0, %v1103_v25  ;;  %v1364_v58 = vsel %vm324_vm0, %v1198_v15, 0.0  ;;  %v1677_v29 = vpop.eup %1676 }
 0x327   : > { %v1361_v14 = vadd.f32 %v1360_v16, %v1359_v17  ;;  %1337 = vadd.xlane.f32.xlu0 %v1336_v40  ;;  %v1679_v9 = vpop.eup %1678 }
 0x328   : > { %v1133_v23 = vadd.f32 0.0009, %v1125_v3  ;;  %v1135_v59 = vadd.f32 0.0009, %v1127_v47 }
 0x329   : > { %v1045_v4 = vpop.f32.mrf.mxu1 }
 0x32a   : > { %v1141_v27 = vmul.f32 %v1133_v23, %v1117_v24  ;;  %v1143_v13 = vmul.f32 %v1135_v59, %v1119_v38  ;;  %v1056_v10 = vmul.f32 %v1045_v4, %v2152_v33 }
 0x32b   : > { %v1681_v48 = vpop.eup %1680 }
 0x32c   : > { %v1197_v19 = vmul.f32 %v1673_v21, %v1141_v27  ;;  %v1199_v60 = vmul.f32 %v1675_v57, %v1143_v13  ;;  %v1104_v53 = vsub.f32 %v1056_v10, %v2626_v11  ;;  %v1347_v28 = vmul.f32 1024.0, %v1681_v48 }
 0x32d   : > { %vm1351_vm2 = vweird.f32 %v1681_v48 }
 0x32e   : > { %v1362_v56 = vsel %vm324_vm0, %v1197_v19, 0.0  ;;  %v1128_v44 = vmul.f32 2.0, %v1104_v53  ;;  %v1366_v61 = vsel %vm324_vm0, %v1199_v60, 0.0  ;;  %v1348_v22 = vsub.f32 1.0, %v1347_v28 }
 0x32f   : > { %v1363_v34 = vadd.f32 %v1362_v56, %v1361_v14 }
 0x330   : > { %v1136_v54 = vadd.f32 0.0009, %v1128_v44  ;;  %v1349_v55 = vmul.f32 %v1681_v48, %v1348_v22 }
 0x331   : > { %v1047_v43 = vpop.f32.mrf.mxu1  ;;  %v1365_v42 = vadd.f32 %v1364_v58, %v1363_v34 }
 0x332   : > { %v1144_v33 = vmul.f32 %v1136_v54, %v1120_v41  ;;  %v1057_v5 = vmul.f32 %v1047_v43, %v2157_v37  ;;  %v1350_v30 = vadd.f32 %v1681_v48, %v1349_v55 }
 0x333   : > { %v1367_v17 = vadd.f32 %v1366_v61, %v1365_v42 }
 0x334   : > { %v1105_v46 = vsub.f32 %v1057_v5, %v2627_v1  ;;  %v1200_v7 = vmul.f32 %v1677_v29, %v1144_v33  ;;  %v1352_v15 = vsel %vm1351_vm2, %v1681_v48, %v1350_v30 }
 0x336   : > { %v1129_v52 = vmul.f32 2.0, %v1105_v46  ;;  %v1368_v0 = vsel %vm324_vm0, %v1200_v7, 0.0 }
 0x337   : > { %v1369_v31 = vadd.f32 %v1368_v0, %v1367_v17 }
 0x338   : > { %v1137_v26 = vadd.f32 0.0009, %v1129_v52 }
 0x33a   : > { %v1145_v36 = vmul.f32 %v1137_v26, %v1121_v2 }
 0x33c   : > { %v1201_v37 = vmul.f32 %v1679_v9, %v1145_v36 }
 0x33e   : > { %v1370_v35 = vsel %vm324_vm0, %v1201_v37, 0.0 }
 0x33f   : > { %v1371_v39 = vadd.f32 %v1370_v35, %v1369_v31 }
 0x341   : > { %1372 = vadd.xlane.f32.xlu0 %v1371_v39 }
 0x39a   : > { %v1338_v51 = vpop.xlane.xlu0 %1337 }
 0x39b   : > { %v1339_v49 = vrot.slane %v1338_v51, 4 }
 0x39d   : > { %v1340_v20 = vadd.f32 %v1339_v49, %v1338_v51 }
 0x39f   : > { %v1341_v32 = vrot.slane %v1340_v20, 2 }
 0x3a1   : > { %v1342_v8 = vadd.f32 %v1341_v32, %v1340_v20 }
 0x3a3   : > { %v1343_v63 = vrot.slane %v1342_v8, 1 }
 0x3a5   : > { %v1344_v50 = vadd.f32 %v1343_v63, %v1342_v8 }
 0x3a7   : > { %1597 = vpush %v1344_v50 }
 0x3a8   : > { %1599 = vpush %v1352_v15 }
 0x3b4   : > { %v1373_v6 = vpop.xlane.xlu0 %1372 }
 0x3b5   : > { %v1374_v25 = vrot.slane %v1373_v6, 4 }
 0x3b7   : > { %v1375_v18 = vadd.f32 %v1374_v25, %v1373_v6 }
 0x3b9   : > { %v1376_v16 = vrot.slane %v1375_v18, 2 }
 0x3bb   : > { %v1377_v3 = vadd.f32 %v1376_v16, %v1375_v18 }
 0x3bd   : > { %v1378_v47 = vrot.slane %v1377_v3, 1 }
 0x3bf   : > { %v1379_v24 = vadd.f32 %v1378_v47, %v1377_v3 }
 0x3c1   : > { %1601 = vpush %v1379_v24 }
 0x3d8   : > { %s1598_s15 = spop %1597 }
 0x3d9   : > { %s1600_s17 = spop %1599 }
 0x3da   : > { %s1354_s18 = smul.f32 %s1600_s17, %s1598_s15 }
 0x3dc   : > { %v1355_v14 = vstv %s1354_s18 }
 0x3dd   : > { %1356 = vst [vmem:[%s265_s13] sm:$0xff] %v1355_v14 }
 0x3de   : > { %1709 = shalt.err (!%p1706_p3)
}
 0x3df   : > { %1603 = dma.vmem_to_hbm [thread:$0]  (%p1849_p5), %s1411_s14, 128, %s1413_s16, %s1393_s19  }
 0x3e0   : > { %s1422_s18 = scalar_lea.hbm %s2575_s6, %s1864_s11  ;;  %s272_s26 = scalar_lea.vmem [#allocation4], %s1535_s29 }
 0x3e1   : > { %s1424_s9 = sshll.u32 %s272_s26, 4  ;;  %s1426_s1 = sshll.u32 %s1422_s18, 4  ;;  %s1425_s9 = int_to_ptr.vmem [resolvable:$true] %s1424_s9  ;;  %s1427_s1 = int_to_ptr.hbm [resolvable:$true] %s1426_s1 }
 0x3e2   : > { %s1398_s20 = scalar_lea.sflag [#allocation5], %s2519_s28  ;;  %s1724_s25 = sshra.s32 %s1427_s1, 4  ;;  %s1725_s25 = int_to_ptr.hbm [resolvable:$true] %s1724_s25 }
 0x3e3   : > { %s1726_s10 = scalar_lea.hbm %s1725_s25, 8  ;;  %s1730_s11 = scalar_lea.hbm %s2575_s6, 16 }
 0x3e4   : > { %p1727_p4 = scmp.ne.s32.totalorder %s1725_s25, %s1726_s10  ;;  %p1731_p9 = scmp.lt.s32.totalorder %s1725_s25, %s2575_s6 }
 0x3e5   : > { %p1732_p10 = scmp.lt.s32.totalorder %s1730_s11, %s1726_s10 }
 0x3e6   : > { %p1728_p7 = pnand %p1727_p4, %p1849_p5 }
 0x3e7   : > { %p1733_p11 = por %p1732_p10, %p1731_p9 }
 0x3e8   : > { %p1729_p8 = pneg %p1728_p7 }
 0x3ea   : > { %p1734_p12 = pnand %p1733_p11, %p1729_p8 }
 0x3f2   : > { %s1602_s2 = spop %1601 }
 0x3f3   : > { %s1389_s0 = smul.f32 %s1602_s2, %s1600_s17 }
 0x3f5   : > { %v1390_v40 = vstv %s1389_s0 }
 0x3f6   : > { %1391 = vst [vmem:[%s272_s26] sm:$0xff] %v1390_v40 }
 0x3f7   : > { %1737 = shalt.err (!%p1734_p12)
}
 0x3f8   : > { %1604 = dma.vmem_to_hbm [thread:$0]  (%p1849_p5), %s1425_s9, 128, %s1427_s1, %s1398_s20  }
 0x3f9 PF: > { %p1614_p13 = scmp.ge.s32.totalorder %s1776_s24, 2  ;;  %s1438_s2 = sand.u32 1, %s1764_s21  }
 0x3fa   : > { %s1439_s28 = scalar_lea.sflag [#allocation3], %s1438_s2 }
 0x3fb   : > { %p1608_p0 = pnand %p1614_p13, %p1853_p6 }
 0x3fd   : > { %p1609_p1 = pneg %p1608_p0 }
 0x3ff   : > { %1755 = dma.done.wait (%p1609_p1), %s1439_s28, 128  }
 0x400   : > { %1757 = vsyncadd (%p1609_p1), %s1439_s28, 4294967168  ;;  %s1449_s17 = scalar_lea.sflag [#allocation5], %s1438_s2 }
 0x401   : > { %1759 = dma.done.wait (%p1609_p1), %s1449_s17, 128  }
 0x402   : > { %1761 = vsyncadd (%p1609_p1), %s1449_s17, 4294967168  ;;  %p20_p5 = scmp.ge.s32.totalorder %s1837_s27, 4   ;;  %s2628_s21 = smov %s1768_s22 }
 0x403   : > { %s2629_s22 = smov %s1772_s23  ;;  %s2630_s23 = smov %s1847_s30 }
 0x404   : > { %s2631_s24 = smov %s1837_s27  ;;  %22 = sbr.rel (!%p20_p5) target bundleno = 9 (0x9), region = 95 }
 0x409   :  { %1455 = vsyncpa [#allocation3], 1 }
 0x40a   :  { %1457 = vsyncpa [#allocation3 + $0x1], 1 }
 0x40b   :  { %1458 = vsyncpa [#allocation5], 1 }
 0x40c   :  { %1460 = vsyncpa [#allocation5 + $0x1], 1 }

</bundles_post_ra>
